<compile_context>
chip_gen: v7x
topology: tpu7x:2x2x1
jax: 0.10.0
libtpu: 0.0.40
codegen_flags: <defaults>
</compile_context>

<pallas_src>
import jax
import jax.numpy as jnp
from jax.experimental import pallas as pl
from jax.experimental.pallas import tpu as pltpu

ACT_DTYPE = jnp.bfloat16   # inter-layer activation storage dtype (halves HBM traffic)
BN_EPS = 1e-5


# ----------------------------------------------------------------------------
# Compiler params (generation-aware VMEM limit)
# ----------------------------------------------------------------------------

_VMEM_LIMIT = None


def _vmem_limit_bytes():
    """~75% of this generation's VMEM, capped; safe on v7x (64 MiB/TC)."""
    global _VMEM_LIMIT
    if _VMEM_LIMIT is None:
        limit = 48 * 1024 * 1024
        try:
            info = pltpu.get_tpu_info()
            cap = getattr(info, "vmem_capacity_bytes", None)
            if cap:
                limit = min(int(cap) * 3 // 4, 96 * 1024 * 1024)
        except Exception:
            pass
        _VMEM_LIMIT = limit
    return _VMEM_LIMIT


def _cparams(dimension_semantics):
    return pltpu.CompilerParams(
        dimension_semantics=dimension_semantics,
        vmem_limit_bytes=_vmem_limit_bytes(),
    )


# ----------------------------------------------------------------------------
# Generic tiled matmul (K-tiled, bf16 MXU, f32 accumulator, fused BN statistics)
# ----------------------------------------------------------------------------

def _make_matmul_kernel(nk, want_stats, has_bias, out_dtype):
    def kernel(*refs):
        a_ref, b_ref = refs[0], refs[1]
        idx = 2
        bias_ref = None
        if has_bias:
            bias_ref = refs[idx]
            idx += 1
        y_ref = refs[idx]
        idx += 1
        if want_stats:
            s_ref, q_ref = refs[idx], refs[idx + 1]
            idx += 2
        acc_ref = refs[idx]

        k = pl.program_id(2)

        @pl.when(k == 0)
        def _():
            acc_ref[...] = jnp.zeros_like(acc_ref)

        acc_ref[...] += jnp.dot(a_ref[...], b_ref[...],
                                preferred_element_type=jnp.float32)

        @pl.when(k == nk - 1)
        def _():
            acc = acc_ref[...]
            if has_bias:
                acc = acc + bias_ref[...]
            y_ref[...] = acc.astype(out_dtype)
            if want_stats:
                s_ref[0] = jnp.sum(acc, axis=0, keepdims=True)
                q_ref[0] = jnp.sum(acc * acc, axis=0, keepdims=True)

    return kernel


def pallas_matmul(a, b, bias=None, want_stats=False, out_dtype=jnp.float32):
    """y = a @ b (+bias). Returns y (possibly M/N-padded) and, if want_stats,
    per-M-tile column sums and sums-of-squares (f32).  Operands are cast to bf16;
    accumulation is f32 on the MXU."""
    a = a.astype(jnp.bfloat16)
    b = b.astype(jnp.bfloat16)
    M, K = a.shape
    K2, N = b.shape
    assert K == K2

    # --- N: keep lane-dense output; pad ragged N (e.g. num_classes) to 128.
    if N % 128 == 0:
        Np, tn = N, (256 if N % 256 == 0 else 128)
    elif N == 64:
        Np, tn = 64, 64
    else:
        Np, tn = pl.cdiv(N, 128) * 128, 128
        b = jnp.pad(b, ((0, 0), (0, Np - N)))
        if bias is not None:
            bias = jnp.pad(bias, (0, Np - N))

    # --- M: large M tiled at 128/256; small ragged M kept as one (full) block.
    if M % 128 == 0:
        Mp, tm = M, (256 if M % 256 == 0 else 128)
    elif M <= 512:
        Mp, tm = M, M
    else:
        Mp, tm = pl.cdiv(M, 128) * 128, 128
        a = jnp.pad(a, ((0, Mp - M), (0, 0)))

    # --- K: bounded reduction tiles with a VMEM f32 accumulator.
    if K % 512 == 0:
        tk = 512
    elif K % 256 == 0:
        tk = 256
    elif K % 128 == 0:
        tk = 128
    else:
        tk = K
    nk = K // tk
    gm, gn = Mp // tm, Np // tn

    in_specs = [
        pl.BlockSpec((tm, tk), lambda i, j, k: (i, k)),
        pl.BlockSpec((tk, tn), lambda i, j, k: (k, j)),
    ]
    args = [a, b]
    if bias is not None:
        in_specs.append(pl.BlockSpec((1, tn), lambda i, j, k: (0, j)))
        args.append(bias.reshape(1, Np).astype(jnp.float32))

    out_shape = [jax.ShapeDtypeStruct((Mp, Np), out_dtype)]
    out_specs = [pl.BlockSpec((tm, tn), lambda i, j, k: (i, j))]
    if want_stats:
        out_shape += [jax.ShapeDtypeStruct((gm, 1, Np), jnp.float32)] * 2
        out_specs += [pl.BlockSpec((1, 1, tn), lambda i, j, k: (i, 0, j))] * 2

    kernel = _make_matmul_kernel(nk, want_stats, bias is not None, out_dtype)
    res = pl.pallas_call(
        kernel,
        out_shape=tuple(out_shape),
        grid=(gm, gn, nk),
        in_specs=in_specs,
        out_specs=tuple(out_specs),
        scratch_shapes=[pltpu.VMEM((tm, tn), jnp.float32)],
        compiler_params=_cparams(("parallel", "parallel", "arbitrary")),
    )(*args)
    if want_stats:
        return res[0], res[1], res[2]
    return res[0]


# ----------------------------------------------------------------------------
# Fused 3x3 convolution (no HBM im2col) + per-channel sum / sumsq
# ----------------------------------------------------------------------------

def _make_conv3x3_kernel(OH, OW, CIN, COUT, stride, out_dtype):
    KH = KW = 3

    def body(get_tap, w_ref, y_ref, s_ref, q_ref):
        s_ref[...] = jnp.zeros_like(s_ref)
        q_ref[...] = jnp.zeros_like(q_ref)

        def row_body(oh, carry):
            acc = jnp.zeros((OW, COUT), jnp.float32)
            for i in range(KH):
                for j in range(KW):
                    a = get_tap(oh, i, j)                               # (OW, CIN) bf16
                    wt = w_ref[pl.ds((i * KW + j) * CIN, CIN), :]        # (CIN, COUT) bf16
                    acc = acc + jnp.dot(a, wt, preferred_element_type=jnp.float32)
            y_ref[0, oh] = acc.astype(out_dtype)
            s_ref[0] += jnp.sum(acc, axis=0, keepdims=True)
            q_ref[0] += jnp.sum(acc * acc, axis=0, keepdims=True)
            return carry

        jax.lax.fori_loop(0, OH, row_body, 0)

    if stride == 1:
        def kernel(x_ref, w_ref, y_ref, s_ref, q_ref):
            def get_tap(oh, i, j):
                return x_ref[0, oh + i, pl.ds(j, OW), :]
            body(get_tap, w_ref, y_ref, s_ref, q_ref)
    else:  # stride == 2: input pre-split into even/odd phases -> contiguous taps
        def kernel(x00, x01, x10, x11, w_ref, y_ref, s_ref, q_ref):
            phases = ((x00, x01), (x10, x11))

            def get_tap(oh, i, j):
                xr = phases[i % 2][j % 2]
                return xr[0, oh + (i // 2), pl.ds(j // 2, OW), :]
            body(get_tap, w_ref, y_ref, s_ref, q_ref)

    return kernel


def conv3x3_fused(x, w, stride):
    """x: (N, H, W, Cin) bf16; w: (3,3,Cin,Cout) bf16; pad=1, stride in {1,2}.
    Returns y (N, OH, OW, Cout) bf16 plus per-image channel sum / sumsq (f32)."""
    N, H, W, CIN = x.shape
    COUT = w.shape[-1]
    OH = (H + 2 - 3) // stride + 1
    OW = (W + 2 - 3) // stride + 1
    xp = jnp.pad(x, ((0, 0), (1, 1), (1, 1), (0, 0)))
    wk = w.reshape(9 * CIN, COUT)

    if stride == 1:
        inputs = [xp]
    else:
        inputs = [xp[:, a::2, b::2, :] for a in (0, 1) for b in (0, 1)]

    in_specs = [pl.BlockSpec((1,) + tuple(p.shape[1:]), lambda b: (b, 0, 0, 0))
                for p in inputs]
    in_specs.append(pl.BlockSpec((9 * CIN, COUT), lambda b: (0, 0)))

    out_shape = (
        jax.ShapeDtypeStruct((N, OH, OW, COUT), ACT_DTYPE),
        jax.ShapeDtypeStruct((N, 1, COUT), jnp.float32),
        jax.ShapeDtypeStruct((N, 1, COUT), jnp.float32),
    )
    out_specs = (
        pl.BlockSpec((1, OH, OW, COUT), lambda b: (b, 0, 0, 0)),
        pl.BlockSpec((1, 1, COUT), lambda b: (b, 0, 0)),
        pl.BlockSpec((1, 1, COUT), lambda b: (b, 0, 0)),
    )

    kernel = _make_conv3x3_kernel(OH, OW, CIN, COUT, stride, ACT_DTYPE)
    y, psum, psq = pl.pallas_call(
        kernel,
        out_shape=out_shape,
        grid=(N,),
        in_specs=in_specs,
        out_specs=out_specs,
        compiler_params=_cparams(("parallel",)),
    )(*inputs, wk)
    return y, psum, psq


# ----------------------------------------------------------------------------
# BatchNorm apply (+ residual + ReLU), tiled over rows
# ----------------------------------------------------------------------------

def _row_tile(M):
    for t in (1024, 512, 256, 128):
        if M % t == 0:
            return t
    return M


def _make_bn_kernel(has_res, relu, out_dtype):
    def kernel(*refs):
        if has_res:
            y_ref, scale_ref, shift_ref, r_ref, o_ref = refs
        else:
            y_ref, scale_ref, shift_ref, o_ref = refs
        x = y_ref[...].astype(jnp.float32)
        out = x * scale_ref[...] + shift_ref[...]
        if has_res:
            out = out + r_ref[...].astype(jnp.float32)
        if relu:
            out = jnp.maximum(out, 0.0)
        o_ref[...] = out.astype(out_dtype)
    return kernel


def bn_apply(y, scale, shift, residual=None, relu=True, out_dtype=ACT_DTYPE):
    M, C = y.shape
    tm = _row_tile(M)
    in_specs = [
        pl.BlockSpec((tm, C), lambda i: (i, 0)),
        pl.BlockSpec((1, C), lambda i: (0, 0)),
        pl.BlockSpec((1, C), lambda i: (0, 0)),
    ]
    args = [y, scale, shift]
    if residual is not None:
        in_specs.append(pl.BlockSpec((tm, C), lambda i: (i, 0)))
        args.append(residual)
    kernel = _make_bn_kernel(residual is not None, relu, out_dtype)
    return pl.pallas_call(
        kernel,
        out_shape=jax.ShapeDtypeStruct((M, C), out_dtype),
        grid=(M // tm,),
        in_specs=in_specs,
        out_specs=pl.BlockSpec((tm, C), lambda i: (i, 0)),
        compiler_params=_cparams(("parallel",)),
    )(*args)


def _bn_scale_shift(total_sum, total_sq, m, gamma, beta, eps=BN_EPS):
    """Training-mode BN: batch mean / biased variance from fused sums."""
    mean = total_sum / m
    var = jnp.maximum(total_sq / m - mean * mean, 0.0)
    scale = gamma.astype(jnp.float32) * jax.lax.rsqrt(var + eps)
    shift = beta.astype(jnp.float32) - mean * scale
    return scale.reshape(1, -1), shift.reshape(1, -1)


# ----------------------------------------------------------------------------
# MaxPool 3x3 / stride 2 / pad 1 (even-odd phase decomposition, no 9x stack)
# ----------------------------------------------------------------------------

def _make_maxpool_kernel(OH, OW, out_dtype):
    def kernel(p00, p01, p10, p11, o_ref):
        phases = ((p00, p01), (p10, p11))
        out = None
        for i in range(3):
            for j in range(3):
                r = phases[i % 2][j % 2]
                win = r[0, pl.ds(i // 2, OH), pl.ds(j // 2, OW), :].astype(jnp.float32)
                out = win if out is None else jnp.maximum(out, win)
        o_ref[0] = out.astype(out_dtype)
    return kernel


def maxpool2d_3x3_s2_p1(x):
    N, H, W, C = x.shape
    OH = (H + 2 - 3) // 2 + 1
    OW = (W + 2 - 3) // 2 + 1
    xp = jnp.pad(x, ((0, 0), (1, 1), (1, 1), (0, 0)), constant_values=-jnp.inf)
    phases = [xp[:, a::2, b::2, :] for a in (0, 1) for b in (0, 1)]
    in_specs = [pl.BlockSpec((1,) + tuple(p.shape[1:]), lambda b: (b, 0, 0, 0))
                for p in phases]
    kernel = _make_maxpool_kernel(OH, OW, x.dtype)
    return pl.pallas_call(
        kernel,
        out_shape=jax.ShapeDtypeStruct((N, OH, OW, C), x.dtype),
        grid=(N,),
        in_specs=in_specs,
        out_specs=pl.BlockSpec((1, OH, OW, C), lambda b: (b, 0, 0, 0)),
        compiler_params=_cparams(("parallel",)),
    )(*phases)


# ----------------------------------------------------------------------------
# Global average pool (AdaptiveAvgPool2d((1,1)))
# ----------------------------------------------------------------------------

def _avgpool_kernel(x_ref, o_ref):
    o_ref[0] = jnp.mean(x_ref[0].astype(jnp.float32), axis=0, keepdims=True)


def global_avgpool(x):
    N, H, W, C = x.shape
    xr = x.reshape(N, H * W, C)
    out = pl.pallas_call(
        _avgpool_kernel,
        out_shape=jax.ShapeDtypeStruct((N, 1, C), jnp.float32),
        grid=(N,),
        in_specs=[pl.BlockSpec((1, H * W, C), lambda b: (b, 0, 0))],
        out_specs=pl.BlockSpec((1, 1, C), lambda b: (b, 0, 0)),
        compiler_params=_cparams(("parallel",)),
    )(xr)
    return out.reshape(N, C)


# ----------------------------------------------------------------------------
# Conv + BN composition
# ----------------------------------------------------------------------------

def im2col(x, kh, kw, stride, pad):
    # Only used for the 7x7 stem (Cin=3): duplication is ~2.3x the *output* size.
    # TODO(synk): fuse the 7x7 stem like the 3x3 path to drop this last im2col.
    N, H, W, C = x.shape
    OH = (H + 2 * pad - kh) // stride + 1
    OW = (W + 2 * pad - kw) // stride + 1
    xp = jnp.pad(x, ((0, 0), (pad, pad), (pad, pad), (0, 0)))
    cols = [xp[:, i:i + stride * OH:stride, j:j + stride * OW:stride, :]
            for i in range(kh) for j in range(kw)]
    a = jnp.concatenate(cols, axis=-1).reshape(N * OH * OW, kh * kw * C)
    return a, (N, OH, OW)


def conv_bn(x, w, gamma, beta, stride, residual=None, relu=True):
    """conv (no bias) -> BatchNorm (batch stats) -> [+residual] -> [ReLU]."""
    kh, kw, cin, cout = w.shape
    wb = w.astype(jnp.bfloat16)

    if kh == 1 and kw == 1:
        xs = x if stride == 1 else x[:, ::stride, ::stride, :]
        n, oh, ow, _ = xs.shape
        m = n * oh * ow
        y, psum, psq = pallas_matmul(xs.reshape(m, cin), wb.reshape(cin, cout),
                                     want_stats=True, out_dtype=ACT_DTYPE)
        if y.shape != (m, cout):
            y = y[:m, :cout]
        total_sum = psum.sum(axis=(0, 1))[:cout]
        total_sq = psq.sum(axis=(0, 1))[:cout]
    elif kh == 3 and kw == 3:
        y4, psum, psq = conv3x3_fused(x, wb, stride)
        n, oh, ow, _ = y4.shape
        m = n * oh * ow
        y = y4.reshape(m, cout)
        total_sum = psum.sum(axis=(0, 1))
        total_sq = psq.sum(axis=(0, 1))
    else:  # 7x7 stem
        pad = (kh - 1) // 2
        a, (n, oh, ow) = im2col(x, kh, kw, stride, pad)
        m = n * oh * ow
        y, psum, psq = pallas_matmul(a, wb.reshape(kh * kw * cin, cout),
                                     want_stats=True, out_dtype=ACT_DTYPE)
        if y.shape != (m, cout):
            y = y[:m, :cout]
        total_sum = psum.sum(axis=(0, 1))[:cout]
        total_sq = psq.sum(axis=(0, 1))[:cout]

    scale, shift = _bn_scale_shift(total_sum, total_sq, float(m), gamma, beta)
    res = None if residual is None else residual.reshape(m, cout)
    out = bn_apply(y, scale, shift, residual=res, relu=relu)
    return out.reshape(n, oh, ow, cout)


def basic_block_forward(x, p):
    stride = p["stride"]
    identity = x
    out = conv_bn(x, p["conv1_w"], p["bn1_g"], p["bn1_b"], stride, relu=True)
    if "down_w" in p:
        identity = conv_bn(x, p["down_w"], p["down_g"], p["down_b"], stride, relu=False)
    out = conv_bn(out, p["conv2_w"], p["bn2_g"], p["bn2_b"], 1,
                  residual=identity, relu=True)
    return out


def bottleneck_block_forward(x, p):
    stride = p["stride"]
    identity = x
    out = conv_bn(x, p["conv1_w"], p["bn1_g"], p["bn1_b"], 1, relu=True)
    out = conv_bn(out, p["conv2_w"], p["bn2_g"], p["bn2_b"], stride, relu=True)
    if "down_w" in p:
        identity = conv_bn(x, p["down_w"], p["down_g"], p["down_b"], stride, relu=False)
    out = conv_bn(out, p["conv3_w"], p["bn3_g"], p["bn3_b"], 1,
                  residual=identity, relu=True)
    return out


_BLOCK_FWD = {"basic": basic_block_forward, "bottleneck": bottleneck_block_forward}
_EXPANSION = {"basic": 1, "bottleneck": 4}


# ----------------------------------------------------------------------------
# Deterministic parameter init (shapes match the PyTorch module __init__)
# ----------------------------------------------------------------------------

def _conv_init(key, kh, kw, cin, cout):
    fan_in = kh * kw * cin
    return jax.random.normal(key, (kh, kw, cin, cout), jnp.float32) * (2.0 / fan_in) ** 0.5


def _bn_init(key, c):
    k1, k2 = jax.random.split(key)
    gamma = jax.random.uniform(k1, (c,), jnp.float32, 0.5, 1.5)
    beta = jax.random.normal(k2, (c,), jnp.float32) * 0.1
    return gamma, beta


def _init_block(key, block_type, inplanes, planes, stride):
    exp = _EXPANSION[block_type]
    keys = jax.random.split(key, 10)
    p = {"stride": stride}
    if block_type == "basic":
        p["conv1_w"] = _conv_init(keys[0], 3, 3, inplanes, planes)
        p["bn1_g"], p["bn1_b"] = _bn_init(keys[1], planes)
        p["conv2_w"] = _conv_init(keys[2], 3, 3, planes, planes)
        p["bn2_g"], p["bn2_b"] = _bn_init(keys[3], planes)
    else:
        p["conv1_w"] = _conv_init(keys[0], 1, 1, inplanes, planes)
        p["bn1_g"], p["bn1_b"] = _bn_init(keys[1], planes)
        p["conv2_w"] = _conv_init(keys[2], 3, 3, planes, planes)
        p["bn2_g"], p["bn2_b"] = _bn_init(keys[3], planes)
        p["conv3_w"] = _conv_init(keys[4], 1, 1, planes, planes * exp)
        p["bn3_g"], p["bn3_b"] = _bn_init(keys[5], planes * exp)
    if stride != 1 or inplanes != planes * exp:
        p["down_w"] = _conv_init(keys[8], 1, 1, inplanes, planes * exp)
        p["down_g"], p["down_b"] = _bn_init(keys[9], planes * exp)
    return p


def init_resnet(key, block_type="basic", counts=(1, 1, 1, 1), num_classes=10):
    exp = _EXPANSION[block_type]
    keys = jax.random.split(key, 8)
    params = {"block_type": block_type}
    params["conv1_w"] = _conv_init(keys[0], 7, 7, 3, 64)
    params["bn1_g"], params["bn1_b"] = _bn_init(keys[1], 64)
    inplanes = 64
    for li, (planes, count, stride) in enumerate(
        zip((64, 128, 256, 512), counts, (1, 2, 2, 2))
    ):
        bkeys = jax.random.split(keys[2 + li], count)
        blocks = [_init_block(bkeys[0], block_type, inplanes, planes, stride)]
        inplanes = planes * exp
        for i in range(1, count):
            blocks.append(_init_block(bkeys[i], block_type, inplanes, planes, 1))
        params[f"layer{li + 1}"] = blocks
    kfc1, kfc2 = jax.random.split(keys[6])
    fc_in = 512 * exp
    bound = 1.0 / (fc_in ** 0.5)
    params["fc_w"] = jax.random.uniform(kfc1, (fc_in, num_classes), jnp.float32, -bound, bound)
    params["fc_b"] = jax.random.uniform(kfc2, (num_classes,), jnp.float32, -bound, bound)
    return params


# ----------------------------------------------------------------------------
# Full forward pass (mirrors ResNet.forward)
# ----------------------------------------------------------------------------

def resnet_forward(x_nchw, params):
    block_fwd = _BLOCK_FWD[params["block_type"]]
    num_classes = params["fc_w"].shape[1]
    x = jnp.transpose(x_nchw, (0, 2, 3, 1)).astype(ACT_DTYPE)   # NCHW -> NHWC
    x = conv_bn(x, params["conv1_w"], params["bn1_g"], params["bn1_b"],
                stride=2, relu=True)
    x = maxpool2d_3x3_s2_p1(x)
    for layer in ("layer1", "layer2", "layer3", "layer4"):
        for blk in params[layer]:
            x = block_fwd(x, blk)
    feats = global_avgpool(x)                                    # (N, 512*expansion) f32
    logits = pallas_matmul(feats, params["fc_w"], bias=params["fc_b"],
                           want_stats=False, out_dtype=jnp.float32)
    return logits[:feats.shape[0], :num_classes]


# TODO(synk): BatchNorm running-stat buffer updates (momentum tracking) are not modeled;
# they do not affect the forward output of a training-mode module.

if __name__ == "__main__":
    key = jax.random.PRNGKey(0)
    kx, kp = jax.random.split(key)
    # Small ResNet (BasicBlock, [1,1,1,1]), batch=2, 3x32x32 input -> 10 classes.
    x = jax.random.normal(kx, (2, 3, 32, 32), jnp.float32)
    params = init_resnet(kp, block_type="basic", counts=(1, 1, 1, 1), num_classes=10)

    logits = resnet_forward(x, params)
    jax.block_until_ready(logits)
    assert logits.shape == (2, 10) and logits.dtype == jnp.float32
    assert bool(jnp.all(jnp.isfinite(logits)))
    print("KERNEL_OK")
</pallas_src>

<mosaic_0001>
module attributes {stable_mosaic.version = 11 : i64} {
  func.func @kernel(%arg0: i32, %arg1: i32, %arg2: i32, %arg3: memref<256x147xbf16, #tpu.memory_space<vmem>>, %arg4: memref<147x64xbf16, #tpu.memory_space<vmem>>, %arg5: memref<256x64xbf16, #tpu.memory_space<vmem>>, %arg6: memref<1x1x64xf32, #tpu.memory_space<vmem>>, %arg7: memref<1x1x64xf32, #tpu.memory_space<vmem>>, %arg8: memref<256x64xf32, #tpu.memory_space<vmem>>) attributes {dimension_semantics = [#tpu.dimension_semantics<parallel>, #tpu.dimension_semantics<parallel>, #tpu.dimension_semantics<arbitrary>], iteration_bounds = array<i64: 2, 1, 1>, scalar_prefetch = 0 : i64, scratch_operands = 1 : i64, tpu.core_type = #tpu.core_type<tc>, window_params = [{transform_indices = @transform_0, window_bounds = array<i64: 256, 147>}, {transform_indices = @transform_1, window_bounds = array<i64: 147, 64>}, {transform_indices = @transform_2, window_bounds = array<i64: 256, 64>}, {transform_indices = @transform_3, window_bounds = array<i64: 1, 1, 64>}, {transform_indices = @transform_4, window_bounds = array<i64: 1, 1, 64>}]} {
    %c0_i32 = arith.constant 0 : i32
    %0 = arith.cmpi eq, %arg2, %c0_i32 : i32
    %1 = arith.extui %0 : i1 to i32
    %c0_i32_0 = arith.constant 0 : i32
    %2 = arith.cmpi ne, %1, %c0_i32_0 : i32
    scf.if %2 {
      %cst_10 = arith.constant 0.000000e+00 : f32
      %12 = vector.broadcast %cst_10 : f32 to vector<256x64xf32>
      %c0_11 = arith.constant 0 : index
      %c0_12 = arith.constant 0 : index
      %13 = vector.load %arg8[%c0_11, %c0_12] : memref<256x64xf32, #tpu.memory_space<vmem>>, vector<256x64xf32>
      tpu.vector_store %arg8[%c0_11, %c0_12], %12 {strides = array<i32>} : memref<256x64xf32, #tpu.memory_space<vmem>>, vector<256x64xf32>,
    } else {
    }
    %c0 = arith.constant 0 : index
    %c0_1 = arith.constant 0 : index
    %3 = vector.load %arg8[%c0, %c0_1] : memref<256x64xf32, #tpu.memory_space<vmem>>, vector<256x64xf32>
    %c0_2 = arith.constant 0 : index
    %c0_3 = arith.constant 0 : index
    %4 = vector.load %arg3[%c0_2, %c0_3] : memref<256x147xbf16, #tpu.memory_space<vmem>>, vector<256x147xbf16>
    %c0_4 = arith.constant 0 : index
    %c0_5 = arith.constant 0 : index
    %5 = vector.load %arg4[%c0_4, %c0_5] : memref<147x64xbf16, #tpu.memory_space<vmem>>, vector<147x64xbf16>
    %cst = arith.constant dense<0.000000e+00> : vector<256x64xf32>
    %6 = tpu.matmul %4, %5, %cst {dimension_numbers = #tpu.dot_dimension_numbers<[1], [0], [0], [1], [0, 0, 1, 1], [], []>} : vector<256x147xbf16>, vector<147x64xbf16>, vector<256x64xf32> -> vector<256x64xf32>
    %7 = arith.addf %3, %6 : vector<256x64xf32>
    %c0_6 = arith.constant 0 : index
    %c0_7 = arith.constant 0 : index
    %8 = vector.load %arg8[%c0_6, %c0_7] : memref<256x64xf32, #tpu.memory_space<vmem>>, vector<256x64xf32>
    tpu.vector_store %arg8[%c0_6, %c0_7], %7 {strides = array<i32>} : memref<256x64xf32, #tpu.memory_space<vmem>>, vector<256x64xf32>,
    %c0_i32_8 = arith.constant 0 : i32
    %9 = arith.cmpi eq, %arg2, %c0_i32_8 : i32
    %10 = arith.extui %9 : i1 to i32
    %c0_i32_9 = arith.constant 0 : i32
    %11 = arith.cmpi ne, %10, %c0_i32_9 : i32
    scf.if %11 {
      %c0_10 = arith.constant 0 : index
      %c0_11 = arith.constant 0 : index
      %12 = vector.load %arg8[%c0_10, %c0_11] : memref<256x64xf32, #tpu.memory_space<vmem>>, vector<256x64xf32>
      %13 = arith.truncf %12 : vector<256x64xf32> to vector<256x64xbf16>
      %c0_12 = arith.constant 0 : index
      %c0_13 = arith.constant 0 : index
      %14 = vector.load %arg5[%c0_12, %c0_13] : memref<256x64xbf16, #tpu.memory_space<vmem>>, vector<256x64xbf16>
      tpu.vector_store %arg5[%c0_12, %c0_13], %13 {strides = array<i32>} : memref<256x64xbf16, #tpu.memory_space<vmem>>, vector<256x64xbf16>,
      %cst_14 = arith.constant dense<0.000000e+00> : vector<64xf32>
      %15 = vector.multi_reduction <add>, %12, %cst_14 [0] : vector<256x64xf32> to vector<64xf32>
      %16 = vector.shape_cast %15 : vector<64xf32> to vector<1x64xf32>
      %c0_15 = arith.constant 0 : index
      %c0_16 = arith.constant 0 : index
      %c0_17 = arith.constant 0 : index
      %17 = vector.load %arg6[%c0_15, %c0_16, %c0_17] : memref<1x1x64xf32, #tpu.memory_space<vmem>>, vector<1x1x64xf32>
      %18 = vector.shape_cast %17 : vector<1x1x64xf32> to vector<1x64xf32>
      %19 = vector.shape_cast %16 : vector<1x64xf32> to vector<1x1x64xf32>
      tpu.vector_store %arg6[%c0_15, %c0_16, %c0_17], %19 {strides = array<i32>} : memref<1x1x64xf32, #tpu.memory_space<vmem>>, vector<1x1x64xf32>,
      %20 = arith.mulf %12, %12 : vector<256x64xf32>
      %cst_18 = arith.constant dense<0.000000e+00> : vector<64xf32>
      %21 = vector.multi_reduction <add>, %20, %cst_18 [0] : vector<256x64xf32> to vector<64xf32>
      %22 = vector.shape_cast %21 : vector<64xf32> to vector<1x64xf32>
      %c0_19 = arith.constant 0 : index
      %c0_20 = arith.constant 0 : index
      %c0_21 = arith.constant 0 : index
      %23 = vector.load %arg7[%c0_19, %c0_20, %c0_21] : memref<1x1x64xf32, #tpu.memory_space<vmem>>, vector<1x1x64xf32>
      %24 = vector.shape_cast %23 : vector<1x1x64xf32> to vector<1x64xf32>
      %25 = vector.shape_cast %22 : vector<1x64xf32> to vector<1x1x64xf32>
      tpu.vector_store %arg7[%c0_19, %c0_20, %c0_21], %25 {strides = array<i32>} : memref<1x1x64xf32, #tpu.memory_space<vmem>>, vector<1x1x64xf32>,
    } else {
    }
    return
  }
  func.func @transform_0(%arg0: i32, %arg1: i32, %arg2: i32) -> (i32, i32) {
    %c0_i32 = arith.constant 0 : i32
    return %arg0, %arg2 : i32, i32
  }
  func.func @transform_1(%arg0: i32, %arg1: i32, %arg2: i32) -> (i32, i32) {
    %c0_i32 = arith.constant 0 : i32
    return %arg2, %arg1 : i32, i32
  }
  func.func @transform_2(%arg0: i32, %arg1: i32, %arg2: i32) -> (i32, i32) {
    %c0_i32 = arith.constant 0 : i32
    return %arg0, %arg1 : i32, i32
  }
  func.func @transform_3(%arg0: i32, %arg1: i32, %arg2: i32) -> (i32, i32, i32) {
    %c0_i32 = arith.constant 0 : i32
    %c0_i32_0 = arith.constant 0 : i32
    return %arg0, %c0_i32, %arg1 : i32, i32, i32
  }
  func.func @transform_4(%arg0: i32, %arg1: i32, %arg2: i32) -> (i32, i32, i32) {
    %c0_i32 = arith.constant 0 : i32
    %c0_i32_0 = arith.constant 0 : i32
    return %arg0, %c0_i32, %arg1 : i32, i32, i32
  }
}

</mosaic_0001>

<bundles_post_ra>
// kernel: tpu_custom_call.1
= control target key start
LH: loop header
LB: loop body
LE: loop exit
PB: predicated region body
PF: predicated region fallthrough
CT: control target
= control target key end

     0   :  { %10 = vsyncpa [#allocation4], 0  ;;  %s2473_s0 = inlined_call_operand.vmem [shape: bf16[512,147], index: 0, kind: input, shape index: {}]   ;;  %s2474_s1 = inlined_call_operand.vmem [shape: bf16[147,64], index: 1, kind: input, shape index: {}]   ;;  %s2475_s2 = inlined_call_operand.vmem [shape: bf16[512,64], index: 2, kind: output, shape index: {0}]   ;;  %s2476_s3 = inlined_call_operand.hbm [shape: f32[2,1,64], index: 3, kind: output, shape index: {1}]   ;;  %s2477_s4 = inlined_call_operand.hbm [shape: f32[2,1,64], index: 4, kind: output, shape index: {2}]  }
   0x1   :  { %12 = vsyncpa [#allocation4 + $0x1], 0 }
   0x2   :  { %13 = vsyncpa [#allocation6], 0 }
   0x3   :  { %15 = vsyncpa [#allocation6 + $0x1], 0  ;;  %s1893_s15 = smov 0   ;;  %s1895_s16 = smov 0  }
   0x4   :  { %s1897_s17 = smov 0   ;;  %s1899_s18 = smov 0  }
   0x5   :  { %s1901_s19 = smov 0   ;;  %s1903_s20 = smov 0  }
   0x6 LB: > { %s1472_s21 = sadd.s32 4294967295, %s1861_s20   ;;  %s1473_s22 = sadd.s32 4294967294, %s1861_s20   ;;  %s1861_s20 = sphi %s1903_s20, %s21_s20   ;;  %s1857_s19 = sphi %s1901_s19, %s2484_s19   ;;  %s1853_s18 = sphi %s1899_s18, %s2483_s18   ;;  %s1849_s17 = sphi %s1897_s17, %s2482_s17   ;;  %s1845_s16 = sphi %s1895_s16, %s2481_s16   ;;  %s1841_s15 = sphi %s1893_s15, %s2480_s15  }
   0x7   : > { %s40_s23 = sadd.s32 1, %s1857_s19  ;;  %s133_s24 = sadd.s32 1, %s1849_s17 }
   0x8   : > { %p42_p0 = scmp.ge.s32.totalorder %s40_s23, 2  ;;  %p143_p1 = scmp.ne.s32.totalorder %s1849_s17, %s1845_s16 }
   0x9   : > { %p144_p2 = scmp.eq.s32.totalorder %s1472_s21, 1  ;;  %p149_p3 = scmp.ne.s32.totalorder %s1845_s16, %s1841_s15 }
   0xa   : > { %s2486_s23 = smov (%p42_p0, %s40_s23), 0  ;;  %p150_p5 = scmp.eq.s32.totalorder %s1473_s22, 1 }
   0xb   : > { %p1933_p4 = por %p144_p2, %p143_p1  ;;  %s128_s26 = ssub.s32 %s1857_s19, %s2486_s23 }
   0xc   : > { %p1477_p6 = scmp.ge.s32.totalorder %s1861_s20, 1  ;;  %p131_p7 = scmp.eq.s32.totalorder %s128_s26, 0 }
   0xd   : > { %p1940_p8 = por %p150_p5, %p149_p3  ;;  %p223_p9 = scmp.lt.s32.totalorder %s1861_s20, 3 }
   0xe   : > { %s1946_s28 = scalar_select %p131_p7, %s1849_s17, %s133_s24  }
   0xf   : > { %p224_p10 = pnand %p1477_p6, %p223_p9 }
  0x10   : > { %v1693_v0 = vld [vmem:[%s2474_s1] sm:$0xff] (!%p224_p10)   ;;  %v1863_v1 = vmov (!%p224_p10), 0   ;;  %v1694_v2 = vld [vmem:[%s2474_s1 + $0x8] sm:$0xff] (!%p224_p10)   ;;  %v1695_v3 = vld [vmem:[%s2474_s1 + $0x10] sm:$0xff] (!%p224_p10)   ;;  %s1478_s9 = sshll.u32 (!%p224_p10), %s1853_s18, 5  ;;  %vm308_vm0 = vcmask (!%p224_p10), 523264  }
  0x11   : > { %227 = sbr.rel (%p224_p10) target bundleno = 422 (0x1a6), region = 28  ;;  %681 = vmatprep.subr.bf16.mxu0 (!%p224_p10), %v1863_v1  ;;  %1610 = vmatprep.subr.bf16.mxu1 (!%p224_p10), %v1863_v1  ;;  %p275_p11 = scmp.lt.s32.totalorder (!%p224_p10), %s1478_s9, 63  ;;  %v1696_v4 = vld [vmem:[%s2474_s1 + $0x18] sm:$0xff] (!%p224_p10)   ;;  %v1864_v5 = vmov (!%p224_p10), 0.0   ;;  %v1697_v6 = vld [vmem:[%s2474_s1 + $0x20] sm:$0xff] (!%p224_p10)   ;;  %vm625_vm1 = vcmask (!%p224_p10), 154624  }
  0x12   : > { %682 = vmatpush1.bf16.msra.mxu0 (!%p224_p10), %v1693_v0  ;;  %1620 = vmatpush1.bf16.msra.mxu1 (!%p224_p10), %v1693_v0  ;;  %309 = vst.msk [vmem:[#allocation2] sm:$0xff] (!%p224_p10), %vm308_vm0, %v1864_v5  ;;  %310 = vst.msk [vmem:[#allocation2 + $0x8] sm:$0xff] (!%p224_p10), %vm308_vm0, %v1864_v5  ;;  %v1698_v8 = vld [vmem:[%s2474_s1 + $0x28] sm:$0xff] (!%p224_p10)   ;;  %v1699_v10 = vld [vmem:[%s2474_s1 + $0x30] sm:$0xff] (!%p224_p10)   ;;  %vm674_vm2 = vcmask (!%p224_p10), 1040384   ;;  %vm675_vm3 = vcmask (!%p224_p10), 1041408  }
  0x13   : > { %683 = vmatprep.subr.bf16.mxu0 (!%p224_p10), %v1863_v1  ;;  %1611 = vmatprep.subr.bf16.mxu1 (!%p224_p10), %v1863_v1  ;;  %311 = vst.msk [vmem:[#allocation2 + $0x10] sm:$0xff] (!%p224_p10), %vm308_vm0, %v1864_v5  ;;  %312 = vst.msk [vmem:[#allocation2 + $0x18] sm:$0xff] (!%p224_p10), %vm308_vm0, %v1864_v5  ;;  %v1700_v11 = vld [vmem:[%s2474_s1 + $0x38] sm:$0xff] (!%p224_p10)   ;;  %v1865_v12 = vmov (!%p224_p10), 65535   ;;  %v1701_v14 = vld [vmem:[%s2474_s1 + $0x40] sm:$0xff] (!%p224_p10)   ;;  %vm1070_vm4 = vcmask (!%p224_p10), 519168  }
  0x14   : > { %313 = vst.msk [vmem:[#allocation2 + $0x20] sm:$0xff] (!%p224_p10), %vm308_vm0, %v1864_v5  ;;  %314 = vst.msk [vmem:[#allocation2 + $0x28] sm:$0xff] (!%p224_p10), %vm308_vm0, %v1864_v5  ;;  %v676_v13 = vsel (!%p224_p10), %vm674_vm2, 4294967295, %v1865_v12  ;;  %v1702_v15 = vld [vmem:[%s2474_s1 + $0x48] ss:$0 sps:$4 sm:$0x33] (!%p224_p10)  }
  0x15   : > { %315 = vst.msk [vmem:[#allocation2 + $0x30] sm:$0xff] (!%p224_p10), %vm308_vm0, %v1864_v5  ;;  %316 = vst.msk [vmem:[#allocation2 + $0x38] sm:$0xff] (!%p224_p10), %vm308_vm0, %v1864_v5  ;;  %v677_v16 = vsel (!%p224_p10), %vm675_vm3, %v676_v13, 0  ;;  %s1573_s24 = sshll.u32 (!%p224_p10), %s1853_s18, 4  ;;  %vm1172_vm5 = vcmask (!%p224_p10), 516096   ;;  %s1866_s14 = smov (!%p224_p10), [#allocation3]  }
  0x16   : > { %684 = vmatpush1.bf16.msra.mxu0 (!%p224_p10), %v1694_v2  ;;  %1621 = vmatpush1.bf16.msra.mxu1 (!%p224_p10), %v1694_v2  ;;  %317 = vst.msk [vmem:[#allocation2 + $0x40] sm:$0xff] (!%p224_p10), %vm308_vm0, %v1864_v5  ;;  %318 = vst.msk [vmem:[#allocation2 + $0x48] sm:$0xff] (!%p224_p10), %vm308_vm0, %v1864_v5  ;;  %v679_v17 = vand.u32 (!%p224_p10), %v1702_v15, %v677_v16  ;;  %s2392_s8 = scalar_lea.hbm (!%p224_p10), %s2476_s3, %s1573_s24  ;;  %s2400_s11 = scalar_lea.hbm (!%p224_p10), %s2477_s4, %s1573_s24 }
  0x17   : > { %685 = vmatprep.subr.bf16.mxu0 (!%p224_p10), %v1863_v1  ;;  %1612 = vmatprep.subr.bf16.mxu1 (!%p224_p10), %v1863_v1  ;;  %319 = vst.msk [vmem:[#allocation2 + $0x50] sm:$0xff] (!%p224_p10), %vm308_vm0, %v1864_v5  ;;  %320 = vst.msk [vmem:[#allocation2 + $0x58] sm:$0xff] (!%p224_p10), %vm308_vm0, %v1864_v5 }
  0x18   : > { %s2488_s9 = smov (!%p275_p11, %s1478_s9), 63  ;;  %321 = vst.msk [vmem:[#allocation2 + $0x60] sm:$0xff] %vm308_vm0, %v1864_v5  ;;  %322 = vst.msk [vmem:[#allocation2 + $0x68] sm:$0xff] %vm308_vm0, %v1864_v5 }
  0x19   : > { %s1577_s12 = sshll.u32 %s2488_s9, 3  ;;  %323 = vst.msk [vmem:[#allocation2 + $0x70] sm:$0xff] %vm308_vm0, %v1864_v5  ;;  %324 = vst.msk [vmem:[#allocation2 + $0x78] sm:$0xff] %vm308_vm0, %v1864_v5  ;;  %v341_v48 = vld [vmem:[#allocation2] sm:$0xff]  ;;  %v342_v51 = vld [vmem:[#allocation2 + $0x8] sm:$0xff]  ;;  %s1482_s13 = sshll.u32 %s2488_s9, 2 }
  0x1a   : > { %686 = vmatpush1.bf16.msra.mxu0 %v1695_v3  ;;  %1622 = vmatpush1.bf16.msra.mxu1 %v1695_v3  ;;  %325 = vst.msk [vmem:[#allocation2 + $0x80] sm:$0xff] %vm308_vm0, %v1864_v5  ;;  %326 = vst.msk [vmem:[#allocation2 + $0x88] sm:$0xff] %vm308_vm0, %v1864_v5  ;;  %s2009_s21 = scalar_lea.vmem %s2473_s0, %s1577_s12  ;;  %v343_v0 = vld [vmem:[#allocation2 + $0x10] sm:$0xff]  ;;  %v344_v3 = vld [vmem:[#allocation2 + $0x18] sm:$0xff]  ;;  %s2097_s22 = scalar_lea.vmem %s2475_s2, %s1482_s13 }
  0x1b   : > { %687 = vmatprep.subr.bf16.mxu0 %v1863_v1  ;;  %1613 = vmatprep.subr.bf16.mxu1 %v1863_v1  ;;  %327 = vst.msk [vmem:[#allocation2 + $0x90] sm:$0xff] %vm308_vm0, %v1864_v5  ;;  %328 = vst.msk [vmem:[#allocation2 + $0x98] sm:$0xff] %vm308_vm0, %v1864_v5  ;;  %v1705_v7 = vld [vmem:[%s2009_s21 + $0x4] ss:$8 sps:$4 sm:$0xff]   ;;  %v1703_v18 = vld [vmem:[%s2009_s21] ss:$8 sps:$4 sm:$0xff]  }
  0x1c   : > { %329 = vst.msk [vmem:[#allocation2 + $0xa0] sm:$0xff] %vm308_vm0, %v1864_v5  ;;  %330 = vst.msk [vmem:[#allocation2 + $0xa8] sm:$0xff] %vm308_vm0, %v1864_v5  ;;  %1525 = vmatprep.mubr.msk.bf16.mxu0 %vm625_vm1, %v1705_v7  ;;  %v1717_v9 = vld [vmem:[%s2009_s21 + $0x84] ss:$8 sps:$4 sm:$0xff]   ;;  %v1715_v19 = vld [vmem:[%s2009_s21 + $0x80] ss:$8 sps:$4 sm:$0xff]  }
  0x1d   : > { %331 = vst.msk [vmem:[#allocation2 + $0xb0] sm:$0xff] %vm308_vm0, %v1864_v5  ;;  %332 = vst.msk [vmem:[#allocation2 + $0xb8] sm:$0xff] %vm308_vm0, %v1864_v5  ;;  %1533 = vmatprep.mubr.msk.bf16.mxu1 %vm625_vm1, %v1717_v9  ;;  %v1706_v20 = vld [vmem:[%s2009_s21 + $0x14] ss:$8 sps:$4 sm:$0xff]   ;;  %v1708_v22 = vld [vmem:[%s2009_s21 + $0x10] ss:$8 sps:$4 sm:$0xff]  }
  0x1e   : > { %333 = vst.msk [vmem:[#allocation2 + $0xc0] sm:$0xff] %vm308_vm0, %v1864_v5  ;;  %334 = vst.msk [vmem:[#allocation2 + $0xc8] sm:$0xff] %vm308_vm0, %v1864_v5  ;;  %688 = vmatpush1.bf16.msra.mxu0 %v1696_v4  ;;  %1623 = vmatpush1.bf16.msra.mxu1 %v1696_v4  ;;  %v1721_v21 = vld [vmem:[%s2009_s21 + $0x94] ss:$8 sps:$4 sm:$0xff]   ;;  %v1723_v23 = vld [vmem:[%s2009_s21 + $0x90] ss:$8 sps:$4 sm:$0xff]  }
  0x1f   : > { %335 = vst.msk [vmem:[#allocation2 + $0xd0] sm:$0xff] %vm308_vm0, %v1864_v5  ;;  %336 = vst.msk [vmem:[#allocation2 + $0xd8] sm:$0xff] %vm308_vm0, %v1864_v5  ;;  %689 = vmatprep.subr.bf16.mxu0 %v1863_v1  ;;  %1614 = vmatprep.subr.bf16.mxu1 %v1863_v1  ;;  %v1709_v24 = vld [vmem:[%s2009_s21 + $0x24] ss:$8 sps:$4 sm:$0xff]   ;;  %v1711_v26 = vld [vmem:[%s2009_s21 + $0x20] ss:$8 sps:$4 sm:$0xff]  }
  0x20   : > { %337 = vst.msk [vmem:[#allocation2 + $0xe0] sm:$0xff] %vm308_vm0, %v1864_v5  ;;  %338 = vst.msk [vmem:[#allocation2 + $0xe8] sm:$0xff] %vm308_vm0, %v1864_v5  ;;  %v1727_v25 = vld [vmem:[%s2009_s21 + $0xa4] ss:$8 sps:$4 sm:$0xff]   ;;  %v1729_v27 = vld [vmem:[%s2009_s21 + $0xa0] ss:$8 sps:$4 sm:$0xff]  }
  0x21   : > { %339 = vst.msk [vmem:[#allocation2 + $0xf0] sm:$0xff] %vm308_vm0, %v1864_v5  ;;  %340 = vst.msk [vmem:[#allocation2 + $0xf8] sm:$0xff] %vm308_vm0, %v1864_v5  ;;  %v1712_v28 = vld [vmem:[%s2009_s21 + $0x34] ss:$8 sps:$4 sm:$0xff]   ;;  %v1714_v30 = vld [vmem:[%s2009_s21 + $0x30] ss:$8 sps:$4 sm:$0xff]  }
  0x22   : > { %690 = vmatpush1.bf16.msra.mxu0 %v1697_v6  ;;  %1624 = vmatpush1.bf16.msra.mxu1 %v1697_v6  ;;  %v1733_v29 = vld [vmem:[%s2009_s21 + $0xb4] ss:$8 sps:$4 sm:$0xff]   ;;  %v1735_v31 = vld [vmem:[%s2009_s21 + $0xb0] ss:$8 sps:$4 sm:$0xff]   ;;  %v1718_v32 = vld [vmem:[%s2009_s21 + $0x44] ss:$8 sps:$4 sm:$0xff]  }
  0x23   : > { %691 = vmatprep.subr.bf16.mxu0 %v1863_v1  ;;  %1615 = vmatprep.subr.bf16.mxu1 %v1863_v1  ;;  %v1739_v33 = vld [vmem:[%s2009_s21 + $0xc4] ss:$8 sps:$4 sm:$0xff]   ;;  %v1720_v34 = vld [vmem:[%s2009_s21 + $0x40] ss:$8 sps:$4 sm:$0xff]   ;;  %v1724_v36 = vld [vmem:[%s2009_s21 + $0x54] ss:$8 sps:$4 sm:$0xff]  }
  0x24   : > { %v1741_v35 = vld [vmem:[%s2009_s21 + $0xc0] ss:$8 sps:$4 sm:$0xff]   ;;  %v1742_v37 = vld [vmem:[%s2009_s21 + $0xd4] ss:$8 sps:$4 sm:$0xff]   ;;  %v1726_v38 = vld [vmem:[%s2009_s21 + $0x50] ss:$8 sps:$4 sm:$0xff]  }
  0x25   : > { %v1744_v39 = vld [vmem:[%s2009_s21 + $0xd0] ss:$8 sps:$4 sm:$0xff]   ;;  %v1730_v40 = vld [vmem:[%s2009_s21 + $0x64] ss:$8 sps:$4 sm:$0xff]   ;;  %v1732_v42 = vld [vmem:[%s2009_s21 + $0x60] ss:$8 sps:$4 sm:$0xff]  }
  0x26   : > { %692 = vmatpush1.bf16.msra.mxu0 %v1698_v8  ;;  %1625 = vmatpush1.bf16.msra.mxu1 %v1698_v8  ;;  %v1745_v41 = vld [vmem:[%s2009_s21 + $0xe4] ss:$8 sps:$4 sm:$0xff]   ;;  %v1747_v43 = vld [vmem:[%s2009_s21 + $0xe0] ss:$8 sps:$4 sm:$0xff]   ;;  %v1736_v44 = vld [vmem:[%s2009_s21 + $0x74] ss:$8 sps:$4 sm:$0xff]  }
  0x27   : > { %693 = vmatprep.subr.bf16.mxu0 %v1863_v1  ;;  %1616 = vmatprep.subr.bf16.mxu1 %v1863_v1  ;;  %v1748_v45 = vld [vmem:[%s2009_s21 + $0xf4] ss:$8 sps:$4 sm:$0xff]   ;;  %v1738_v46 = vld [vmem:[%s2009_s21 + $0x70] ss:$8 sps:$4 sm:$0xff]   ;;  %v357_v49 = vld [vmem:[#allocation2 + $0x80] sm:$0xff]  ;;  %s2382_s9 = sand.u32 1, %s1845_s16  }
  0x28   : > { %v1750_v47 = vld [vmem:[%s2009_s21 + $0xf0] ss:$8 sps:$4 sm:$0xff]   ;;  %v358_v53 = vld [vmem:[#allocation2 + $0x88] sm:$0xff]  ;;  %s266_s26 = scalar_lea.vmem [#allocation3], %s2382_s9  ;;  %s272_s30 = scalar_lea.vmem [#allocation5], %s2382_s9 }
  0x29   : > { %v360_v9 = vld [vmem:[#allocation2 + $0x98] sm:$0xff]  ;;  %s1306_s29 = sshll.u32 %s266_s26, 4  ;;  %s1320_s5 = sshll.u32 %s272_s30, 4  ;;  %s2394_s29 = int_to_ptr.vmem [resolvable:$true] %s1306_s29  ;;  %s2402_s5 = int_to_ptr.vmem [resolvable:$true] %s1320_s5 }
  0x2a   : > { %694 = vmatpush1.bf16.msra.mxu0 %v1699_v10  ;;  %1626 = vmatpush1.bf16.msra.mxu1 %v1699_v10  ;;  %s1285_s12 = scalar_lea.sflag [#allocation4], %s2382_s9  ;;  %s1751_s13 = scalar_lea.vmem %s2394_s29, 16 }
  0x2b   : > { %695 = vmatprep.subr.bf16.mxu0 %v1863_v1  ;;  %1617 = vmatprep.subr.bf16.mxu1 %v1863_v1  ;;  %p1752_p12 = scmp.ne.s32.totalorder %s2394_s29, %s1751_s13  ;;  %s1755_s21 = sshll.u32 %s1866_s14, 4  ;;  %s1756_s21 = int_to_ptr.vmem [resolvable:$false] %s1755_s21 }
  0x2c   : > { %p1758_p1 = scmp.lt.s32.totalorder %s2394_s29, %s1756_s21 }
  0x2d   : > { %p1753_p13 = pnand %p1752_p12, %p1933_p4 }
  0x2e   : > { %696 = vmatpush1.bf16.msra.mxu0 %v1700_v11  ;;  %1627 = vmatpush1.bf16.msra.mxu1 %v1700_v11 }
  0x2f   : > { %697 = vmatprep.subr.bf16.mxu0 %v1863_v1  ;;  %1618 = vmatprep.subr.bf16.mxu1 %v1863_v1  ;;  %p1754_p0 = pneg %p1753_p13 }
  0x32   : > { %698 = vmatpush1.bf16.msra.mxu0 %v1701_v14  ;;  %1628 = vmatpush1.bf16.msra.mxu1 %v1701_v14 }
  0x33   : > { %699 = vmatprep.subr.bf16.mxu0 %v1863_v1  ;;  %1619 = vmatprep.subr.bf16.mxu1 %v1863_v1  ;;  %v359_v1 = vld [vmem:[#allocation2 + $0x90] sm:$0xff] }
  0x36   : > { %700 = vmatpush1.bf16.msra.mxu0 %v679_v17  ;;  %1629 = vmatpush1.bf16.msra.mxu1 %v679_v17 }
  0x39   : > { %714 = vmatmul.mubr.bf16.vlgmr.msra.gmra.mrb[0].mxu0 %v1703_v18  ;;  %778 = vmatmul.mubr.bf16.vlgmr.msra.gmra.mrb[0].mxu1 %v1715_v19 }
  0x3a   : > { %1526 = vmatprep.mubr.msk.bf16.mxu0 %vm625_vm1, %v1706_v20  ;;  %1534 = vmatprep.mubr.msk.bf16.mxu1 %vm625_vm1, %v1721_v21 }
  0x41   : > { %722 = vmatmul.mubr.bf16.gmra.mrb[4].mxu0 %v1708_v22  ;;  %786 = vmatmul.mubr.bf16.gmra.mrb[4].mxu1 %v1723_v23  ;;  %v345_v23 = vld [vmem:[#allocation2 + $0x20] sm:$0xff] }
  0x42   : > { %1527 = vmatprep.mubr.msk.bf16.mxu0 %vm625_vm1, %v1709_v24  ;;  %1535 = vmatprep.mubr.msk.bf16.mxu1 %vm625_vm1, %v1727_v25  ;;  %v361_v25 = vld [vmem:[#allocation2 + $0xa0] sm:$0xff] }
  0x49   : > { %730 = vmatmul.mubr.bf16.gmra.mrb[8].mxu0 %v1711_v26  ;;  %794 = vmatmul.mubr.bf16.gmra.mrb[8].mxu1 %v1729_v27  ;;  %v346_v27 = vld [vmem:[#allocation2 + $0x28] sm:$0xff] }
  0x4a   : > { %1528 = vmatprep.mubr.msk.bf16.mxu0 %vm625_vm1, %v1712_v28  ;;  %1536 = vmatprep.mubr.msk.bf16.mxu1 %vm625_vm1, %v1733_v29 }
  0x51   : > { %738 = vmatmul.mubr.bf16.gmra.mrb[12].mxu0 %v1714_v30  ;;  %802 = vmatmul.mubr.bf16.gmra.mrb[12].mxu1 %v1735_v31 }
  0x52   : > { %1529 = vmatprep.mubr.msk.bf16.mxu0 %vm625_vm1, %v1718_v32  ;;  %1537 = vmatprep.mubr.msk.bf16.mxu1 %vm625_vm1, %v1739_v33 }
  0x59   : > { %746 = vmatmul.mubr.bf16.gmra.mrb[16].mxu0 %v1720_v34  ;;  %810 = vmatmul.mubr.bf16.gmra.mrb[16].mxu1 %v1741_v35 }
  0x5a   : > { %1530 = vmatprep.mubr.msk.bf16.mxu0 %vm625_vm1, %v1724_v36  ;;  %1538 = vmatprep.mubr.msk.bf16.mxu1 %vm625_vm1, %v1742_v37 }
  0x61   : > { %754 = vmatmul.mubr.bf16.gmra.mrb[20].mxu0 %v1726_v38  ;;  %818 = vmatmul.mubr.bf16.gmra.mrb[20].mxu1 %v1744_v39 }
  0x62   : > { %1531 = vmatprep.mubr.msk.bf16.mxu0 %vm625_vm1, %v1730_v40  ;;  %1539 = vmatprep.mubr.msk.bf16.mxu1 %vm625_vm1, %v1745_v41 }
  0x69   : > { %762 = vmatmul.mubr.bf16.gmra.mrb[24].mxu0 %v1732_v42  ;;  %826 = vmatmul.mubr.bf16.gmra.mrb[24].mxu1 %v1747_v43  ;;  %v362_v43 = vld [vmem:[#allocation2 + $0xa8] sm:$0xff] }
  0x6a   : > { %1532 = vmatprep.mubr.msk.bf16.mxu0 %vm625_vm1, %v1736_v44  ;;  %1540 = vmatprep.mubr.msk.bf16.mxu1 %vm625_vm1, %v1748_v45 }
  0x71   : > { %770 = vmatmul.mubr.bf16.gmra.mrb[28].mxu0 %v1738_v46  ;;  %834 = vmatmul.mubr.bf16.gmra.mrb[28].mxu1 %v1750_v47  ;;  %v347_v46 = vld [vmem:[#allocation2 + $0x30] sm:$0xff] }
 0x10c   : > { %v715_v50 = vpop.f32.mrb[0].mxu0  ;;  %v779_v52 = vpop.f32.mrb[0].mxu1 }
 0x10d   : > { %v842_v54 = vadd.f32 %v715_v50, %v341_v48  ;;  %v717_v55 = vpop.f32.mrb[1].mxu0  ;;  %v858_v56 = vadd.f32 %v779_v52, %v357_v49  ;;  %v781_v57 = vpop.f32.mrb[1].mxu1  ;;  %v363_v48 = vld [vmem:[#allocation2 + $0xb0] sm:$0xff] }
 0x10e   : > { %v718_v58 = vpop.f32.mrb[2].mxu0  ;;  %v782_v59 = vpop.f32.mrb[2].mxu1 }
 0x10f   : > { %875 = vst.msk [vmem:[#allocation2] sm:$0xff] %vm308_vm0, %v842_v54  ;;  %v843_v60 = vadd.f32 %v718_v58, %v342_v51  ;;  %v720_v61 = vpop.f32.mrb[3].mxu0  ;;  %891 = vst.msk [vmem:[#allocation2 + $0x80] sm:$0xff] %vm308_vm0, %v858_v56  ;;  %v859_v62 = vadd.f32 %v782_v59, %v358_v53  ;;  %v784_v63 = vpop.f32.mrb[3].mxu1  ;;  %v348_v51 = vld [vmem:[#allocation2 + $0x38] sm:$0xff] }
 0x110   : > { %v364_v58 = vld [vmem:[#allocation2 + $0xb8] sm:$0xff] }
 0x111   : > { %876 = vst.msk [vmem:[#allocation2 + $0x8] sm:$0xff] %vm308_vm0, %v843_v60  ;;  %892 = vst.msk [vmem:[#allocation2 + $0x88] sm:$0xff] %vm308_vm0, %v859_v62 }
 0x114   : > { %v723_v2 = vpop.f32.mrb[4].mxu0  ;;  %v787_v4 = vpop.f32.mrb[4].mxu1 }
 0x115   : > { %v844_v5 = vadd.f32 %v723_v2, %v343_v0  ;;  %v725_v6 = vpop.f32.mrb[5].mxu0  ;;  %v860_v7 = vadd.f32 %v787_v4, %v359_v1  ;;  %v789_v8 = vpop.f32.mrb[5].mxu1 }
 0x116   : > { %v2099_v10 = vld [vmem:[#allocation2] sm:$0xff]  ;;  %v726_v11 = vpop.f32.mrb[6].mxu0  ;;  %v790_v13 = vpop.f32.mrb[6].mxu1 }
 0x117   : > { %v2101_v12 = vld [vmem:[#allocation2 + $0x80] sm:$0xff]  ;;  %v1578_v14 = vpack.c.bf16 %v2099_v10, %v2099_v10  ;;  %877 = vst.msk [vmem:[#allocation2 + $0x10] sm:$0xff] %vm308_vm0, %v844_v5  ;;  %v845_v15 = vadd.f32 %v726_v11, %v344_v3  ;;  %v728_v16 = vpop.f32.mrb[7].mxu0  ;;  %893 = vst.msk [vmem:[#allocation2 + $0x90] sm:$0xff] %vm308_vm0, %v860_v7  ;;  %v792_v17 = vpop.f32.mrb[7].mxu1  ;;  %v861_v21 = vadd.f32 %v790_v13, %v360_v9  ;;  %v1103_v9 = vsel %vm308_vm0, %v2099_v10, 0.0 }
 0x118   : > { %v911_v18 = vld [vmem:[#allocation2 + $0x8] sm:$0xff]  ;;  %v1594_v19 = vpack.c.bf16 %v2101_v12, %v2101_v12  ;;  %v1174_v59 = vmul.f32 %v2099_v10, %v2099_v10  ;;  %v349_v16 = vld [vmem:[#allocation2 + $0x40] sm:$0xff] }
 0x119   : > { %v2109_v20 = vld [vmem:[#allocation2 + $0x88] sm:$0xff]  ;;  %1071 = vst.msk [vmem:[%s2097_s22] sm:$0xf] %vm1070_vm4, %v1578_v14  ;;  %v1579_v22 = vpack.c.bf16 %v911_v18, %v911_v18  ;;  %v1175_v53 = vmul.f32 %v911_v18, %v911_v18  ;;  %v1104_v0 = vsel %vm308_vm0, %v911_v18, 0.0  ;;  %v365_v17 = vld [vmem:[#allocation2 + $0xc0] sm:$0xff] }
 0x11a   : > { %878 = vst.msk [vmem:[#allocation2 + $0x18] sm:$0xff] %vm308_vm0, %v845_v15  ;;  %v1595_v24 = vpack.c.bf16 %v2109_v20, %v2109_v20  ;;  %894 = vst.msk [vmem:[#allocation2 + $0x98] sm:$0xff] %vm308_vm0, %v861_v21  ;;  %v1105_v15 = vadd.f32 %v1104_v0, %v1103_v9  ;;  %v1206_v10 = vsel %vm308_vm0, %v1174_v59, 0.0  ;;  %v367_v59 = vld [vmem:[#allocation2 + $0xd0] sm:$0xff] }
 0x11b   : > { %1087 = vst.msk [vmem:[%s2097_s22 + $0x40] sm:$0xf] %vm1070_vm4, %v1594_v19  ;;  %1072 = vst.msk [vmem:[%s2097_s22 + $0x4] sm:$0xf] %vm1070_vm4, %v1579_v22  ;;  %v1207_v11 = vsel %vm308_vm0, %v1175_v53, 0.0 }
 0x11c   : > { %v731_v26 = vpop.f32.mrb[8].mxu0  ;;  %1088 = vst.msk [vmem:[%s2097_s22 + $0x44] sm:$0xf] %vm1070_vm4, %v1595_v24  ;;  %v795_v28 = vpop.f32.mrb[8].mxu1  ;;  %v1208_v21 = vadd.f32 %v1207_v11, %v1206_v10 }
 0x11d   : > { %v846_v29 = vadd.f32 %v731_v26, %v345_v23  ;;  %v733_v30 = vpop.f32.mrb[9].mxu0  ;;  %v862_v31 = vadd.f32 %v795_v28, %v361_v25  ;;  %v797_v32 = vpop.f32.mrb[9].mxu1  ;;  %v350_v25 = vld [vmem:[#allocation2 + $0x48] sm:$0xff] }
 0x11e   : > { %v912_v33 = vld [vmem:[#allocation2 + $0x10] sm:$0xff]  ;;  %v734_v34 = vpop.f32.mrb[10].mxu0  ;;  %v798_v36 = vpop.f32.mrb[10].mxu1 }
 0x11f   : > { %v2123_v35 = vld [vmem:[#allocation2 + $0x90] sm:$0xff]  ;;  %v1580_v37 = vpack.c.bf16 %v912_v33, %v912_v33  ;;  %879 = vst.msk [vmem:[#allocation2 + $0x20] sm:$0xff] %vm308_vm0, %v846_v29  ;;  %v847_v38 = vadd.f32 %v734_v34, %v346_v27  ;;  %v736_v39 = vpop.f32.mrb[11].mxu0  ;;  %895 = vst.msk [vmem:[#allocation2 + $0xa0] sm:$0xff] %vm308_vm0, %v862_v31  ;;  %v800_v40 = vpop.f32.mrb[11].mxu1  ;;  %v863_v49 = vadd.f32 %v798_v36, %v362_v43  ;;  %v1106_v13 = vsel %vm308_vm0, %v912_v33, 0.0 }
 0x120   : > { %v1596_v42 = vpack.c.bf16 %v2123_v35, %v2123_v35  ;;  %v1176_v1 = vmul.f32 %v912_v33, %v912_v33  ;;  %v1107_v22 = vadd.f32 %v1106_v13, %v1105_v15  ;;  %v366_v33 = vld [vmem:[#allocation2 + $0xc8] sm:$0xff]  ;;  %v368_v13 = vld [vmem:[#allocation2 + $0xd8] sm:$0xff] }
 0x121   : > { %v913_v41 = vld [vmem:[#allocation2 + $0x18] sm:$0xff]  ;;  %1073 = vst.msk [vmem:[%s2097_s22 + $0x8] sm:$0xf] %vm1070_vm4, %v1580_v37 }
 0x122   : > { %v1581_v44 = vpack.c.bf16 %v913_v41, %v913_v41  ;;  %880 = vst.msk [vmem:[#allocation2 + $0x28] sm:$0xff] %vm308_vm0, %v847_v38  ;;  %v2132_v45 = vld [vmem:[#allocation2 + $0x98] sm:$0xff]  ;;  %896 = vst.msk [vmem:[#allocation2 + $0xa8] sm:$0xff] %vm308_vm0, %v863_v49  ;;  %v1209_v18 = vsel %vm308_vm0, %v1176_v1, 0.0  ;;  %v1177_v19 = vmul.f32 %v913_v41, %v913_v41  ;;  %v1108_v23 = vsel %vm308_vm0, %v913_v41, 0.0 }
 0x123   : > { %1089 = vst.msk [vmem:[%s2097_s22 + $0x48] sm:$0xf] %vm1070_vm4, %v1596_v42  ;;  %v1597_v47 = vpack.c.bf16 %v2132_v45, %v2132_v45  ;;  %v1210_v36 = vadd.f32 %v1209_v18, %v1208_v21 }
 0x124   : > { %1074 = vst.msk [vmem:[%s2097_s22 + $0xc] sm:$0xf] %vm1070_vm4, %v1581_v44  ;;  %v739_v50 = vpop.f32.mrb[12].mxu0  ;;  %v803_v52 = vpop.f32.mrb[12].mxu1  ;;  %v1211_v41 = vsel %vm308_vm0, %v1177_v19, 0.0 }
 0x125   : > { %1090 = vst.msk [vmem:[%s2097_s22 + $0x4c] sm:$0xf] %vm1070_vm4, %v1597_v47  ;;  %v848_v54 = vadd.f32 %v739_v50, %v347_v46  ;;  %v741_v55 = vpop.f32.mrb[13].mxu0  ;;  %v864_v56 = vadd.f32 %v803_v52, %v363_v48  ;;  %v805_v57 = vpop.f32.mrb[13].mxu1  ;;  %v1109_v48 = vadd.f32 %v1108_v23, %v1107_v22 }
 0x126   : > { %v914_v60 = vld [vmem:[#allocation2 + $0x20] sm:$0xff]  ;;  %v742_v61 = vpop.f32.mrb[14].mxu0  ;;  %v806_v63 = vpop.f32.mrb[14].mxu1 }
 0x127   : > { %v2145_v62 = vld [vmem:[#allocation2 + $0xa0] sm:$0xff]  ;;  %v1582_v2 = vpack.c.bf16 %v914_v60, %v914_v60  ;;  %881 = vst.msk [vmem:[#allocation2 + $0x30] sm:$0xff] %vm308_vm0, %v848_v54  ;;  %v849_v3 = vadd.f32 %v742_v61, %v348_v51  ;;  %v744_v4 = vpop.f32.mrb[15].mxu0  ;;  %897 = vst.msk [vmem:[#allocation2 + $0xb0] sm:$0xff] %vm308_vm0, %v864_v56  ;;  %v808_v5 = vpop.f32.mrb[15].mxu1  ;;  %v865_v8 = vadd.f32 %v806_v63, %v364_v58  ;;  %v1110_v42 = vsel %vm308_vm0, %v914_v60, 0.0 }
 0x128   : > { %v1598_v7 = vpack.c.bf16 %v2145_v62, %v2145_v62  ;;  %v1178_v28 = vmul.f32 %v914_v60, %v914_v60  ;;  %v1212_v56 = vadd.f32 %v1211_v41, %v1210_v36  ;;  %v1111_v57 = vadd.f32 %v1110_v42, %v1109_v48  ;;  %v351_v58 = vld [vmem:[#allocation2 + $0x50] sm:$0xff]  ;;  %v353_v36 = vld [vmem:[#allocation2 + $0x60] sm:$0xff] }
 0x129   : > { %v2150_v6 = vld [vmem:[#allocation2 + $0x28] sm:$0xff]  ;;  %1075 = vst.msk [vmem:[%s2097_s22 + $0x10] sm:$0xf] %vm1070_vm4, %v1582_v2  ;;  %v352_v2 = vld [vmem:[#allocation2 + $0x58] sm:$0xff] }
 0x12a   : > { %v1583_v14 = vpack.c.bf16 %v2150_v6, %v2150_v6  ;;  %882 = vst.msk [vmem:[#allocation2 + $0x38] sm:$0xff] %vm308_vm0, %v849_v3  ;;  %898 = vst.msk [vmem:[#allocation2 + $0xb8] sm:$0xff] %vm308_vm0, %v865_v8  ;;  %v2171_v27 = vld [vmem:[#allocation2 + $0xa8] sm:$0xff]  ;;  %v1213_v52 = vsel %vm308_vm0, %v1178_v28, 0.0  ;;  %v1179_v53 = vmul.f32 %v2150_v6, %v2150_v6  ;;  %v1112_v61 = vsel %vm308_vm0, %v2150_v6, 0.0 }
 0x12b   : > { %1091 = vst.msk [vmem:[%s2097_s22 + $0x50] sm:$0xf] %vm1070_vm4, %v1598_v7  ;;  %v1599_v34 = vpack.c.bf16 %v2171_v27, %v2171_v27  ;;  %v1214_v0 = vadd.f32 %v1213_v52, %v1212_v56 }
 0x12c   : > { %1076 = vst.msk [vmem:[%s2097_s22 + $0x14] sm:$0xf] %vm1070_vm4, %v1583_v14  ;;  %v747_v24 = vpop.f32.mrb[16].mxu0  ;;  %v811_v26 = vpop.f32.mrb[16].mxu1  ;;  %v1215_v4 = vsel %vm308_vm0, %v1179_v53, 0.0  ;;  %v1113_v14 = vadd.f32 %v1112_v61, %v1111_v57  ;;  %v370_v53 = vld [vmem:[#allocation2 + $0xe8] sm:$0xff] }
 0x12d   : > { %v850_v29 = vadd.f32 %v747_v24, %v349_v16  ;;  %v749_v30 = vpop.f32.mrb[17].mxu0  ;;  %v866_v31 = vadd.f32 %v811_v26, %v365_v17  ;;  %v813_v32 = vpop.f32.mrb[17].mxu1  ;;  %1092 = vst.msk [vmem:[%s2097_s22 + $0x54] sm:$0xf] %vm1070_vm4, %v1599_v34  ;;  %v1216_v24 = vadd.f32 %v1215_v4, %v1214_v0 }
 0x12e   : > { %v916_v37 = vld [vmem:[#allocation2 + $0x30] sm:$0xff]  ;;  %v750_v38 = vpop.f32.mrb[18].mxu0  ;;  %v814_v39 = vpop.f32.mrb[18].mxu1 }
 0x12f   : > { %v2175_v40 = vld [vmem:[#allocation2 + $0xb0] sm:$0xff]  ;;  %v1584_v43 = vpack.c.bf16 %v916_v37, %v916_v37  ;;  %883 = vst.msk [vmem:[#allocation2 + $0x40] sm:$0xff] %vm308_vm0, %v850_v29  ;;  %v851_v44 = vadd.f32 %v750_v38, %v350_v25  ;;  %v752_v46 = vpop.f32.mrb[19].mxu0  ;;  %899 = vst.msk [vmem:[#allocation2 + $0xc0] sm:$0xff] %vm308_vm0, %v866_v31  ;;  %v816_v47 = vpop.f32.mrb[19].mxu1  ;;  %v867_v50 = vadd.f32 %v814_v39, %v366_v33  ;;  %v1114_v5 = vsel %vm308_vm0, %v916_v37, 0.0 }
 0x130   : > { %v1600_v51 = vpack.c.bf16 %v2175_v40, %v2175_v40  ;;  %v1180_v63 = vmul.f32 %v916_v37, %v916_v37  ;;  %v1115_v25 = vadd.f32 %v1114_v5, %v1113_v14  ;;  %v369_v37 = vld [vmem:[#allocation2 + $0xe0] sm:$0xff] }
 0x131   : > { %v917_v49 = vld [vmem:[#allocation2 + $0x38] sm:$0xff]  ;;  %1077 = vst.msk [vmem:[%s2097_s22 + $0x18] sm:$0xf] %vm1070_vm4, %v1584_v43 }
 0x132   : > { %v1585_v54 = vpack.c.bf16 %v917_v49, %v917_v49  ;;  %884 = vst.msk [vmem:[#allocation2 + $0x48] sm:$0xff] %vm308_vm0, %v851_v44  ;;  %v2191_v55 = vld [vmem:[#allocation2 + $0xb8] sm:$0xff]  ;;  %900 = vst.msk [vmem:[#allocation2 + $0xc8] sm:$0xff] %vm308_vm0, %v867_v50  ;;  %v1217_v10 = vsel %vm308_vm0, %v1180_v63, 0.0  ;;  %v1181_v18 = vmul.f32 %v917_v49, %v917_v49  ;;  %v1116_v30 = vsel %vm308_vm0, %v917_v49, 0.0  ;;  %v354_v44 = vld [vmem:[#allocation2 + $0x68] sm:$0xff] }
 0x133   : > { %v1601_v60 = vpack.c.bf16 %v2191_v55, %v2191_v55  ;;  %1093 = vst.msk [vmem:[%s2097_s22 + $0x58] sm:$0xf] %vm1070_vm4, %v1600_v51  ;;  %v1218_v34 = vadd.f32 %v1217_v10, %v1216_v24  ;;  %v1117_v42 = vadd.f32 %v1116_v30, %v1115_v25  ;;  %v371_v10 = vld [vmem:[#allocation2 + $0xf0] sm:$0xff]  ;;  %v356_v24 = vld [vmem:[#allocation2 + $0x78] sm:$0xff] }
 0x134   : > { %1078 = vst.msk [vmem:[%s2097_s22 + $0x1c] sm:$0xf] %vm1070_vm4, %v1585_v54  ;;  %v755_v1 = vpop.f32.mrb[20].mxu0  ;;  %v819_v3 = vpop.f32.mrb[20].mxu1  ;;  %v1219_v39 = vsel %vm308_vm0, %v1181_v18, 0.0 }
 0x135   : > { %1094 = vst.msk [vmem:[%s2097_s22 + $0x5c] sm:$0xf] %vm1070_vm4, %v1601_v60  ;;  %v852_v7 = vadd.f32 %v755_v1, %v351_v58  ;;  %v757_v8 = vpop.f32.mrb[21].mxu0  ;;  %v868_v9 = vadd.f32 %v819_v3, %v367_v59  ;;  %v821_v11 = vpop.f32.mrb[21].mxu1  ;;  %v1220_v54 = vadd.f32 %v1219_v39, %v1218_v34 }
 0x136   : > { %v918_v6 = vld [vmem:[#allocation2 + $0x40] sm:$0xff]  ;;  %v758_v15 = vpop.f32.mrb[22].mxu0  ;;  %v822_v16 = vpop.f32.mrb[22].mxu1 }
 0x137   : > { %v2206_v17 = vld [vmem:[#allocation2 + $0xc0] sm:$0xff]  ;;  %v1586_v19 = vpack.c.bf16 %v918_v6, %v918_v6  ;;  %885 = vst.msk [vmem:[#allocation2 + $0x50] sm:$0xff] %vm308_vm0, %v852_v7  ;;  %v853_v21 = vadd.f32 %v758_v15, %v352_v2  ;;  %v760_v22 = vpop.f32.mrb[23].mxu0  ;;  %901 = vst.msk [vmem:[#allocation2 + $0xd0] sm:$0xff] %vm308_vm0, %v868_v9  ;;  %v824_v23 = vpop.f32.mrb[23].mxu1  ;;  %v869_v28 = vadd.f32 %v822_v16, %v368_v13  ;;  %v1118_v41 = vsel %vm308_vm0, %v918_v6, 0.0 }
 0x138   : > { %v1602_v29 = vpack.c.bf16 %v2206_v17, %v2206_v17  ;;  %v1182_v31 = vmul.f32 %v918_v6, %v918_v6  ;;  %v1119_v56 = vadd.f32 %v1118_v41, %v1117_v42  ;;  %v355_v16 = vld [vmem:[#allocation2 + $0x70] sm:$0xff] }
 0x139   : > { %v919_v26 = vld [vmem:[#allocation2 + $0x48] sm:$0xff]  ;;  %1079 = vst.msk [vmem:[%s2097_s22 + $0x20] sm:$0xf] %vm1070_vm4, %v1586_v19 }
 0x13a   : > { %v1587_v32 = vpack.c.bf16 %v919_v26, %v919_v26  ;;  %886 = vst.msk [vmem:[#allocation2 + $0x58] sm:$0xff] %vm308_vm0, %v853_v21  ;;  %v2217_v33 = vld [vmem:[#allocation2 + $0xc8] sm:$0xff]  ;;  %902 = vst.msk [vmem:[#allocation2 + $0xd8] sm:$0xff] %vm308_vm0, %v869_v28  ;;  %v1221_v47 = vsel %vm308_vm0, %v1182_v31, 0.0  ;;  %v1183_v48 = vmul.f32 %v919_v26, %v919_v26  ;;  %v1120_v61 = vsel %vm308_vm0, %v919_v26, 0.0 }
 0x13b   : > { %v1603_v38 = vpack.c.bf16 %v2217_v33, %v2217_v33  ;;  %1095 = vst.msk [vmem:[%s2097_s22 + $0x60] sm:$0xf] %vm1070_vm4, %v1602_v29  ;;  %v1222_v4 = vadd.f32 %v1221_v47, %v1220_v54  ;;  %v1121_v6 = vadd.f32 %v1120_v61, %v1119_v56 }
 0x13c   : > { %1080 = vst.msk [vmem:[%s2097_s22 + $0x24] sm:$0xf] %vm1070_vm4, %v1587_v32  ;;  %v763_v43 = vpop.f32.mrb[24].mxu0  ;;  %v827_v46 = vpop.f32.mrb[24].mxu1  ;;  %v1223_v9 = vsel %vm308_vm0, %v1183_v48, 0.0  ;;  %v372_v32 = vld [vmem:[#allocation2 + $0xf8] sm:$0xff] }
 0x13d   : > { %1096 = vst.msk [vmem:[%s2097_s22 + $0x64] sm:$0xf] %vm1070_vm4, %v1603_v38  ;;  %v854_v49 = vadd.f32 %v763_v43, %v353_v36  ;;  %v765_v50 = vpop.f32.mrb[25].mxu0  ;;  %v870_v51 = vadd.f32 %v827_v46, %v369_v37  ;;  %v829_v52 = vpop.f32.mrb[25].mxu1  ;;  %v1224_v21 = vadd.f32 %v1223_v9, %v1222_v4 }
 0x13e   : > { %v920_v57 = vld [vmem:[#allocation2 + $0x50] sm:$0xff]  ;;  %v766_v58 = vpop.f32.mrb[26].mxu0  ;;  %v830_v59 = vpop.f32.mrb[26].mxu1 }
 0x13f   : > { %v2231_v60 = vld [vmem:[#allocation2 + $0xd0] sm:$0xff]  ;;  %v1588_v63 = vpack.c.bf16 %v920_v57, %v920_v57  ;;  %v1184_v0 = vmul.f32 %v920_v57, %v920_v57  ;;  %887 = vst.msk [vmem:[#allocation2 + $0x60] sm:$0xff] %vm308_vm0, %v854_v49  ;;  %v855_v1 = vadd.f32 %v766_v58, %v354_v44  ;;  %v768_v2 = vpop.f32.mrb[27].mxu0  ;;  %903 = vst.msk [vmem:[#allocation2 + $0xe0] sm:$0xff] %vm308_vm0, %v870_v51  ;;  %v832_v3 = vpop.f32.mrb[27].mxu1  ;;  %v1122_v11 = vsel %vm308_vm0, %v920_v57, 0.0 }
 0x140   : > { %v871_v7 = vadd.f32 %v830_v59, %v370_v53  ;;  %v1604_v8 = vpack.c.bf16 %v2231_v60, %v2231_v60  ;;  %v1123_v22 = vadd.f32 %v1122_v11, %v1121_v6  ;;  %v1190_v11 = vmul.f32 %v2101_v12, %v2101_v12 }
 0x141   : > { %v921_v5 = vld [vmem:[#allocation2 + $0x58] sm:$0xff]  ;;  %1081 = vst.msk [vmem:[%s2097_s22 + $0x28] sm:$0xf] %vm1070_vm4, %v1588_v63  ;;  %v1225_v19 = vsel %vm308_vm0, %v1184_v0, 0.0 }
 0x142   : > { %v1589_v13 = vpack.c.bf16 %v921_v5, %v921_v5  ;;  %888 = vst.msk [vmem:[#allocation2 + $0x68] sm:$0xff] %vm308_vm0, %v855_v1  ;;  %v2243_v14 = vld [vmem:[#allocation2 + $0xd8] sm:$0xff]  ;;  %v1185_v15 = vmul.f32 %v921_v5, %v921_v5  ;;  %904 = vst.msk [vmem:[#allocation2 + $0xe8] sm:$0xff] %vm308_vm0, %v871_v7  ;;  %v1124_v26 = vsel %vm308_vm0, %v921_v5, 0.0  ;;  %v1226_v34 = vadd.f32 %v1225_v19, %v1224_v21 }
 0x143   : > { %v1605_v18 = vpack.c.bf16 %v2243_v14, %v2243_v14  ;;  %1097 = vst.msk [vmem:[%s2097_s22 + $0x68] sm:$0xf] %vm1070_vm4, %v1604_v8  ;;  %v1125_v49 = vadd.f32 %v1124_v26, %v1123_v22  ;;  %v1191_v26 = vmul.f32 %v2109_v20, %v2109_v20 }
 0x144   : > { %1082 = vst.msk [vmem:[%s2097_s22 + $0x2c] sm:$0xf] %vm1070_vm4, %v1589_v13  ;;  %v771_v23 = vpop.f32.mrb[28].mxu0  ;;  %v835_v25 = vpop.f32.mrb[28].mxu1  ;;  %v1227_v36 = vsel %vm308_vm0, %v1185_v15, 0.0 }
 0x145   : > { %1098 = vst.msk [vmem:[%s2097_s22 + $0x6c] sm:$0xf] %vm1070_vm4, %v1605_v18  ;;  %v856_v28 = vadd.f32 %v771_v23, %v355_v16  ;;  %v773_v29 = vpop.f32.mrb[29].mxu0  ;;  %v872_v30 = vadd.f32 %v835_v25, %v371_v10  ;;  %v837_v31 = vpop.f32.mrb[29].mxu1  ;;  %v1228_v58 = vadd.f32 %v1227_v36, %v1226_v34  ;;  %v1134_v25 = vsel %vm308_vm0, %v2101_v12, 0.0 }
 0x146   : > { %v922_v37 = vld [vmem:[#allocation2 + $0x60] sm:$0xff]  ;;  %v774_v38 = vpop.f32.mrb[30].mxu0  ;;  %v838_v39 = vpop.f32.mrb[30].mxu1  ;;  %v1237_v31 = vsel %vm308_vm0, %v1190_v11, 0.0  ;;  %v1192_v34 = vmul.f32 %v2123_v35, %v2123_v35 }
 0x147   : > { %v2257_v41 = vld [vmem:[#allocation2 + $0xe0] sm:$0xff]  ;;  %v1590_v42 = vpack.c.bf16 %v922_v37, %v922_v37  ;;  %v1126_v43 = vsel %vm308_vm0, %v922_v37, 0.0  ;;  %v1186_v44 = vmul.f32 %v922_v37, %v922_v37  ;;  %889 = vst.msk [vmem:[#allocation2 + $0x70] sm:$0xff] %vm308_vm0, %v856_v28  ;;  %v857_v46 = vadd.f32 %v774_v38, %v356_v24  ;;  %v776_v47 = vpop.f32.mrb[31].mxu0  ;;  %905 = vst.msk [vmem:[#allocation2 + $0xf0] sm:$0xff] %vm308_vm0, %v872_v30  ;;  %v840_v48 = vpop.f32.mrb[31].mxu1 }
 0x148   : > { %v873_v51 = vadd.f32 %v838_v39, %v372_v32  ;;  %v1606_v52 = vpack.c.bf16 %v2257_v41, %v2257_v41  ;;  %v1127_v59 = vadd.f32 %v1126_v43, %v1125_v49  ;;  %v1136_v32 = vsel %vm308_vm0, %v2109_v20, 0.0 }
 0x149   : > { %v923_v50 = vld [vmem:[#allocation2 + $0x68] sm:$0xff]  ;;  %1083 = vst.msk [vmem:[%s2097_s22 + $0x30] sm:$0xf] %vm1070_vm4, %v1590_v42  ;;  %v1229_v53 = vsel %vm308_vm0, %v1186_v44, 0.0  ;;  %v1239_v37 = vsel %vm308_vm0, %v1191_v26, 0.0  ;;  %v1138_v38 = vsel %vm308_vm0, %v2123_v35, 0.0  ;;  %v1193_v39 = vmul.f32 %v2132_v45, %v2132_v45 }
 0x14a   : > { %v1591_v54 = vpack.c.bf16 %v923_v50, %v923_v50  ;;  %v1187_v56 = vmul.f32 %v923_v50, %v923_v50  ;;  %890 = vst.msk [vmem:[#allocation2 + $0x78] sm:$0xff] %vm308_vm0, %v857_v46  ;;  %v2268_v57 = vld [vmem:[#allocation2 + $0xe8] sm:$0xff]  ;;  %906 = vst.msk [vmem:[#allocation2 + $0xf8] sm:$0xff] %vm308_vm0, %v873_v51  ;;  %v1128_v63 = vsel %vm308_vm0, %v923_v50, 0.0  ;;  %v1230_v0 = vadd.f32 %v1229_v53, %v1228_v58 }
 0x14b   : > { %v1607_v61 = vpack.c.bf16 %v2268_v57, %v2268_v57  ;;  %1099 = vst.msk [vmem:[%s2097_s22 + $0x70] sm:$0xf] %vm1070_vm4, %v1606_v52  ;;  %v1129_v2 = vadd.f32 %v1128_v63, %v1127_v59  ;;  %v1140_v44 = vsel %vm308_vm0, %v2132_v45, 0.0  ;;  %v1194_v20 = vmul.f32 %v2145_v62, %v2145_v62 }
 0x14c   : > { %1084 = vst.msk [vmem:[%s2097_s22 + $0x34] sm:$0xf] %vm1070_vm4, %v1591_v54  ;;  %v1231_v1 = vsel %vm308_vm0, %v1187_v56, 0.0  ;;  %v1241_v46 = vsel %vm308_vm0, %v1192_v34, 0.0  ;;  %v1142_v49 = vsel %vm308_vm0, %v2145_v62, 0.0  ;;  %v1195_v35 = vmul.f32 %v2171_v27, %v2171_v27 }
 0x14d   : > { %1100 = vst.msk [vmem:[%s2097_s22 + $0x74] sm:$0xf] %vm1070_vm4, %v1607_v61  ;;  %v1232_v13 = vadd.f32 %v1231_v1, %v1230_v0  ;;  %v1243_v50 = vsel %vm308_vm0, %v1193_v39, 0.0  ;;  %v1144_v45 = vsel %vm308_vm0, %v2171_v27, 0.0  ;;  %v1196_v53 = vmul.f32 %v2175_v40, %v2175_v40 }
 0x14e   : > { %v924_v3 = vld [vmem:[#allocation2 + $0x70] sm:$0xff]  ;;  %v1245_v54 = vsel %vm308_vm0, %v1194_v20, 0.0  ;;  %v1146_v62 = vsel %vm308_vm0, %v2175_v40, 0.0  ;;  %v1197_v59 = vmul.f32 %v2191_v55, %v2191_v55  ;;  %v1247_v61 = vsel %vm308_vm0, %v1195_v35, 0.0 }
 0x14f   : > { %v2281_v4 = vld [vmem:[#allocation2 + $0xf0] sm:$0xff]  ;;  %v1592_v5 = vpack.c.bf16 %v924_v3, %v924_v3  ;;  %v1130_v7 = vsel %vm308_vm0, %v924_v3, 0.0  ;;  %v1188_v8 = vmul.f32 %v924_v3, %v924_v3  ;;  %v1148_v27 = vsel %vm308_vm0, %v2191_v55, 0.0 }
 0x150   : > { %v1608_v9 = vpack.c.bf16 %v2281_v4, %v2281_v4  ;;  %v1131_v6 = vadd.f32 %v1130_v7, %v1129_v2  ;;  %v1198_v1 = vmul.f32 %v2206_v17, %v2206_v17  ;;  %v1249_v2 = vsel %vm308_vm0, %v1196_v53, 0.0 }
 0x151   : > { %v925_v15 = vld [vmem:[#allocation2 + $0x78] sm:$0xff]  ;;  %1085 = vst.msk [vmem:[%s2097_s22 + $0x38] sm:$0xf] %vm1070_vm4, %v1592_v5  ;;  %v1233_v16 = vsel %vm308_vm0, %v1188_v8, 0.0  ;;  %v1150_v40 = vsel %vm308_vm0, %v2206_v17, 0.0  ;;  %v1199_v7 = vmul.f32 %v2217_v33, %v2217_v33  ;;  %v1251_v8 = vsel %vm308_vm0, %v1197_v59, 0.0 }
 0x152   : > { %v1593_v10 = vpack.c.bf16 %v925_v15, %v925_v15  ;;  %v1132_v18 = vsel %vm308_vm0, %v925_v15, 0.0  ;;  %v1189_v19 = vmul.f32 %v925_v15, %v925_v15  ;;  %v2292_v21 = vld [vmem:[#allocation2 + $0xf8] sm:$0xff]  ;;  %1101 = vst.msk [vmem:[%s2097_s22 + $0x78] sm:$0xf] %vm1070_vm4, %v1608_v9  ;;  %v1234_v22 = vadd.f32 %v1233_v16, %v1232_v13 }
 0x153   : > { %v1133_v23 = vadd.f32 %v1132_v18, %v1131_v6  ;;  %v1609_v24 = vpack.c.bf16 %v2292_v21, %v2292_v21  ;;  %v1152_v55 = vsel %vm308_vm0, %v2217_v33, 0.0  ;;  %v1200_v13 = vmul.f32 %v2231_v60, %v2231_v60 }
 0x154   : > { %1086 = vst.msk [vmem:[%s2097_s22 + $0x3c] sm:$0xf] %vm1070_vm4, %v1593_v10  ;;  %v1235_v28 = vsel %vm308_vm0, %v1189_v19, 0.0  ;;  %v1253_v6 = vsel %vm308_vm0, %v1198_v1, 0.0  ;;  %v1154_v17 = vsel %vm308_vm0, %v2231_v60, 0.0  ;;  %v1201_v10 = vmul.f32 %v2243_v14, %v2243_v14 }
 0x155   : > { %v1135_v29 = vadd.f32 %v1134_v25, %v1133_v23  ;;  %v1236_v30 = vadd.f32 %v1235_v28, %v1234_v22  ;;  %1102 = vst.msk [vmem:[%s2097_s22 + $0x7c] sm:$0xf] %vm1070_vm4, %v1609_v24  ;;  %v1255_v18 = vsel %vm308_vm0, %v1199_v7, 0.0  ;;  %v1156_v33 = vsel %vm308_vm0, %v2243_v14, 0.0  ;;  %s1757_s22 = scalar_lea.vmem %s1756_s21, 32 }
 0x156   : > { %v1202_v23 = vmul.f32 %v2257_v41, %v2257_v41  ;;  %v1257_v24 = vsel %vm308_vm0, %v1200_v13, 0.0  ;;  %v1158_v60 = vsel %vm308_vm0, %v2257_v41, 0.0  ;;  %v1203_v28 = vmul.f32 %v2268_v57, %v2268_v57  ;;  %p1759_p2 = scmp.lt.s32.totalorder %s1757_s22, %s1751_s13 }
 0x157   : > { %v1137_v12 = vadd.f32 %v1136_v32, %v1135_v29  ;;  %v1238_v36 = vadd.f32 %v1237_v31, %v1236_v30  ;;  %v1204_v29 = vmul.f32 %v2281_v4, %v2281_v4  ;;  %v1259_v30 = vsel %vm308_vm0, %v1201_v10, 0.0 }
 0x158   : > { %v1160_v32 = vsel %vm308_vm0, %v2268_v57, 0.0  ;;  %v1162_v34 = vsel %vm308_vm0, %v2281_v4, 0.0  ;;  %v1164_v57 = vsel %vm308_vm0, %v2292_v21, 0.0  ;;  %p1760_p3 = por %p1759_p2, %p1758_p1 }
 0x159   : > { %v1139_v42 = vadd.f32 %v1138_v38, %v1137_v12  ;;  %v1240_v43 = vadd.f32 %v1239_v37, %v1238_v36  ;;  %v1261_v12 = vsel %vm308_vm0, %v1202_v23, 0.0  ;;  %v1205_v37 = vmul.f32 %v2292_v21, %v2292_v21 }
 0x15a   : > { %v1263_v38 = vsel %vm308_vm0, %v1203_v28, 0.0  ;;  %v1265_v39 = vsel %vm308_vm0, %v1204_v29, 0.0  ;;  %p1761_p5 = pnand %p1760_p3, %p1754_p0 }
 0x15b   : > { %v1141_v47 = vadd.f32 %v1140_v44, %v1139_v42  ;;  %v1242_v48 = vadd.f32 %v1241_v46, %v1240_v43  ;;  %v1267_v4 = vsel %vm308_vm0, %v1205_v37, 0.0 }
 0x15d   : > { %v1143_v51 = vadd.f32 %v1142_v49, %v1141_v47  ;;  %v1244_v52 = vadd.f32 %v1243_v50, %v1242_v48 }
 0x15f   : > { %v1145_v56 = vadd.f32 %v1144_v45, %v1143_v51  ;;  %v1246_v58 = vadd.f32 %v1245_v54, %v1244_v52 }
 0x161   : > { %v1147_v63 = vadd.f32 %v1146_v62, %v1145_v56  ;;  %v1248_v0 = vadd.f32 %v1247_v61, %v1246_v58 }
 0x163   : > { %v1149_v3 = vadd.f32 %v1148_v27, %v1147_v63  ;;  %v1250_v5 = vadd.f32 %v1249_v2, %v1248_v0 }
 0x165   : > { %v1151_v9 = vadd.f32 %v1150_v40, %v1149_v3  ;;  %v1252_v11 = vadd.f32 %v1251_v8, %v1250_v5 }
 0x167   : > { %v1153_v15 = vadd.f32 %v1152_v55, %v1151_v9  ;;  %v1254_v16 = vadd.f32 %v1253_v6, %v1252_v11 }
 0x169   : > { %v1155_v19 = vadd.f32 %v1154_v17, %v1153_v15  ;;  %v1256_v22 = vadd.f32 %v1255_v18, %v1254_v16 }
 0x16b   : > { %v1157_v25 = vadd.f32 %v1156_v33, %v1155_v19  ;;  %v1258_v26 = vadd.f32 %v1257_v24, %v1256_v22 }
 0x16d   : > { %v1159_v31 = vadd.f32 %v1158_v60, %v1157_v25  ;;  %v1260_v14 = vadd.f32 %v1259_v30, %v1258_v26 }
 0x16f   : > { %v1161_v41 = vadd.f32 %v1160_v32, %v1159_v31  ;;  %v1262_v36 = vadd.f32 %v1261_v12, %v1260_v14 }
 0x171   : > { %v1163_v42 = vadd.f32 %v1162_v34, %v1161_v41  ;;  %v1264_v43 = vadd.f32 %v1263_v38, %v1262_v36 }
 0x173   : > { %v1165_v44 = vadd.f32 %v1164_v57, %v1163_v42  ;;  %v1266_v20 = vadd.f32 %v1265_v39, %v1264_v43 }
 0x175   : > { %v1166_v46 = vrot.slane %v1165_v44, 4  ;;  %v1268_v47 = vadd.f32 %v1267_v4, %v1266_v20 }
 0x177   : > { %v1167_v48 = vadd.f32 %v1166_v46, %v1165_v44  ;;  %v1269_v49 = vrot.slane %v1268_v47, 4 }
 0x179   : > { %v1168_v35 = vrot.slane %v1167_v48, 2  ;;  %v1270_v50 = vadd.f32 %v1269_v49, %v1268_v47 }
 0x17b   : > { %v1169_v51 = vadd.f32 %v1168_v35, %v1167_v48  ;;  %v1271_v52 = vrot.slane %v1270_v50, 2 }
 0x17d   : > { %v1170_v21 = vrot.slane %v1169_v51, 1  ;;  %v1272_v45 = vadd.f32 %v1271_v52, %v1270_v50 }
 0x17f   : > { %v1171_v53 = vadd.f32 %v1170_v21, %v1169_v51  ;;  %v1273_v54 = vrot.slane %v1272_v45, 1 }
 0x181   : > { %1173 = vst.msk [vmem:[%s266_s26] sm:$0x1] %vm1172_vm5, %v1171_v53  ;;  %v1274_v56 = vadd.f32 %v1273_v54, %v1272_v45 }
 0x182   : > { %1764 = shalt.err (!%p1761_p5)
}
 0x183   : > { %s1765_s24 = scalar_lea.hbm %s2392_s8, 16  ;;  %s1769_s7 = scalar_lea.hbm %s2476_s3, 32 }
 0x184   : > { %p1766_p6 = scmp.ne.s32.totalorder %s2392_s8, %s1765_s24  ;;  %p1770_p10 = scmp.lt.u32.totalorder %s2392_s8, %s2476_s3 }
 0x185   : > { %p1771_p11 = scmp.lt.u32.totalorder %s1769_s7, %s1765_s24  ;;  %p1773_p13 = scmp.lt.u32.totalorder %s1765_s24, %s2392_s8 }
 0x186   : > { %p1767_p7 = pnand %p1766_p6, %p1933_p4 }
 0x187   : > { %p1772_p12 = por %p1771_p11, %p1770_p10 }
 0x188   : > { %p1768_p9 = pneg %p1767_p7 }
 0x189   : > { %p1774_p0 = por %p1773_p13, %p1772_p12 }
 0x18b   : > { %p1775_p1 = pnand %p1774_p0, %p1768_p9 }
 0x18d   : > { %1778 = shalt.err (!%p1775_p1)
}
 0x18e   : > { %1630 = dma.vmem_to_hbm [thread:$0]  (%p1933_p4), %s2394_s29, 16, %s2392_s8, %s1285_s12   ;;  %1275 = vst.msk [vmem:[%s272_s30] sm:$0x1] %vm1172_vm5, %v1274_v56 }
 0x18f   : > { %s1289_s13 = scalar_lea.sflag [#allocation6], %s2382_s9  ;;  %s1779_s14 = scalar_lea.vmem %s2402_s5, 16 }
 0x190   : > { %p1780_p2 = scmp.ne.s32.totalorder %s2402_s5, %s1779_s14  ;;  %s1867_s21 = smov [#allocation5]  }
 0x191   : > { %s1783_s22 = sshll.u32 %s1867_s21, 4  ;;  %s1784_s22 = int_to_ptr.vmem [resolvable:$false] %s1783_s22 }
 0x192   : > { %p1781_p3 = pnand %p1780_p2, %p1933_p4  ;;  %s1785_s24 = scalar_lea.vmem %s1784_s22, 32 }
 0x193   : > { %p1786_p6 = scmp.lt.s32.totalorder %s2402_s5, %s1784_s22  ;;  %p1787_p7 = scmp.lt.s32.totalorder %s1785_s24, %s1779_s14 }
 0x194   : > { %p1782_p5 = pneg %p1781_p3 }
 0x195   : > { %p1788_p9 = por %p1787_p7, %p1786_p6 }
 0x197   : > { %p1789_p10 = pnand %p1788_p9, %p1782_p5 }
 0x199   : > { %1792 = shalt.err (!%p1789_p10)
}
 0x19a   : > { %s1793_s9 = scalar_lea.hbm %s2400_s11, 16  ;;  %s1797_s8 = scalar_lea.hbm %s2477_s4, 32 }
 0x19b   : > { %p1794_p11 = scmp.ne.s32.totalorder %s2400_s11, %s1793_s9  ;;  %p1798_p0 = scmp.lt.u32.totalorder %s2400_s11, %s2477_s4 }
 0x19c   : > { %p1799_p1 = scmp.lt.u32.totalorder %s1797_s8, %s1793_s9  ;;  %p1801_p3 = scmp.lt.u32.totalorder %s1793_s9, %s2400_s11 }
 0x19d   : > { %p1795_p12 = pnand %p1794_p11, %p1933_p4 }
 0x19e   : > { %p1800_p2 = por %p1799_p1, %p1798_p0 }
 0x19f   : > { %p1796_p13 = pneg %p1795_p12 }
 0x1a0   : > { %p1802_p5 = por %p1801_p3, %p1800_p2 }
 0x1a2   : > { %p1803_p6 = pnand %p1802_p5, %p1796_p13 }
 0x1a4   : > { %1806 = shalt.err (!%p1803_p6)
}
 0x1a5   : > { %1631 = dma.vmem_to_hbm [thread:$0]  (%p1933_p4), %s2402_s5, 16, %s2400_s11, %s1289_s13  }
 0x1a6 PF: > { %p1641_p7 = scmp.ge.s32.totalorder %s1861_s20, 2  ;;  %s1343_s6 = sand.u32 1, %s1841_s15  }
 0x1a7   : > { %s1344_s7 = scalar_lea.sflag [#allocation4], %s1343_s6 }
 0x1a8   : > { %p1635_p9 = pnand %p1641_p7, %p1940_p8 }
 0x1aa   : > { %1832 = dma.done.wait (!%p1635_p9), %s1344_s7, 16  }
 0x1ab   : > { %1834 = vsyncadd (!%p1635_p9), %s1344_s7, 4294967280  ;;  %s1352_s18 = scalar_lea.sflag [#allocation6], %s1343_s6 }
 0x1ac   : > { %1836 = dma.done.wait (!%p1635_p9), %s1352_s18, 16  }
 0x1ad   : > { %1838 = vsyncadd (!%p1635_p9), %s1352_s18, 4294967280  ;;  %s21_s20 = sadd.s32 1, %s1861_s20   ;;  %s2480_s15 = smov %s1845_s16 }
 0x1ae   : > { %p18_p10 = scmp.ge.s32.totalorder %s21_s20, 4   ;;  %s2481_s16 = smov %s1849_s17 }
 0x1af   : > { %s2482_s17 = smov %s1946_s28  ;;  %s2483_s18 = smov %s1857_s19 }
 0x1b0   : > { %s2484_s19 = smov %s2486_s23  ;;  %20 = sbr.rel (!%p18_p10) target bundleno = 6 (0x6), region = 103 }
 0x1b7   :  { %1356 = vsyncpa [#allocation4], 1 }
 0x1b8   :  { %1358 = vsyncpa [#allocation4 + $0x1], 1 }
 0x1b9   :  { %1359 = vsyncpa [#allocation6], 1 }
 0x1ba   :  { %1361 = vsyncpa [#allocation6 + $0x1], 1 }

</bundles_post_ra>
